<compile_context>
chip_gen: v7x
topology: tpu7x:2x2x1
jax: 0.10.0
libtpu: 0.0.40
codegen_flags: <defaults>
</compile_context>

<pallas_src>
import functools

import jax
import jax.numpy as jnp
from jax.experimental import pallas as pl
from jax.experimental.pallas import tpu as pltpu

LN_EPS = 1e-5
OUT_CH = 64          # channel_ln output features (fixed to 64 in the module)
LANE = 128           # TPU lane width


def _round_up(n, m):
    return (n + m - 1) // m * m


def _pick_tb(batch, max_tb=8):
    """Largest divisor of batch (<= max_tb) keeping >= 2 grid steps when possible."""
    divisors = [t for t in range(1, min(batch, max_tb) + 1) if batch % t == 0]
    two_step = [t for t in divisors if batch // t >= 2]
    return max(two_step) if two_step else max(divisors)


def _encoder_kernel(x_ref, w1_ref, w2_ref, b2_ref, o_ref, *, inv_c, inv_f, tb):
    # x_ref: [TB, C, F] f32 (native layout, one TB-slab of the batch per grid step)
    x = x_ref[...]

    # ---- LayerNorm over channels (axis=1), single-pass stats, f32 ----
    s = jnp.sum(x, axis=1, keepdims=True)
    ss = jnp.sum(x * x, axis=1, keepdims=True)
    mu = s * inv_c
    var = jnp.maximum(ss * inv_c - mu * mu, 0.0)
    xn = (x - mu) * jax.lax.rsqrt(var + LN_EPS)                    # [TB, C, F]

    # ---- channel_ln projection, transpose-free:
    # ht[b,o,f] = sum_c (w1*gamma1)[o,c] * xn[b,c,f]
    # (bias/beta1 terms are constant along f -> removed exactly by LN2 centering)
    ht = jnp.einsum('boc,bcf->bof', w1_ref[...], xn.astype(jnp.bfloat16),
                    preferred_element_type=jnp.float32)            # [TB, 64, F] f32

    # ---- LayerNorm over features (last axis), single-pass stats, f32 ----
    s2 = jnp.sum(ht, axis=-1, keepdims=True)
    ss2 = jnp.sum(ht * ht, axis=-1, keepdims=True)
    mu2 = s2 * inv_f
    var2 = jnp.maximum(ss2 * inv_f - mu2 * mu2, 0.0)
    hn = (ht - mu2) * jax.lax.rsqrt(var2 + LN_EPS)                 # [TB, 64, F]

    # ---- feat_ln projection as one lane-dense 2-D GEMM: [TB*64, F] @ [F, d_pad] ----
    hn2 = hn.reshape(tb * OUT_CH, hn.shape[-1]).astype(jnp.bfloat16)
    out = jnp.dot(hn2, w2_ref[...], preferred_element_type=jnp.float32)
    out = out + b2_ref[...]                                        # [TB*64, d_pad]
    o_ref[...] = out.astype(o_ref.dtype)


def encoder_forward(x, params, *, tb=None):
    """x: [B, C, F] float32. params: dict (see init_params). Returns [B, 64, d_hid]."""
    x = x.astype(jnp.float32)
    B, C, F = x.shape
    w1, w2 = params["w1"], params["w2"]            # [64, C], [d_hid, F] (PyTorch layout)
    b2 = params["b2"]                              # [d_hid]
    g1 = params["ln1_g"]                           # [C]
    g2, be2 = params["ln2_g"], params["ln2_b"]     # [F]
    d_hid = w2.shape[0]
    d_pad = _round_up(d_hid, LANE)                 # lane-dense output width

    if tb is None:
        tb = _pick_tb(B)
    assert B % tb == 0, (B, tb)

    # Fold LN affines into the projection weights (f32 folding, then cast to bf16).
    #  * gamma1 scales the contraction dim of w1; b1 / beta1 only add per-output
    #    constants along the feat axis, which LayerNorm2's centering removes exactly.
    #  * gamma2 scales rows of w2^T; beta2 folds into the final bias.
    w1f = (w1 * g1[None, :]).astype(jnp.bfloat16)                  # [64, C]
    w1b = jnp.broadcast_to(w1f, (tb, OUT_CH, C))                   # batched-matmul operand
    w2f = g2[:, None] * w2.T                                       # [F, d_hid] f32
    b2f = b2 + be2 @ w2.T                                          # [d_hid]    f32
    w2p = jnp.pad(w2f, ((0, 0), (0, d_pad - d_hid))).astype(jnp.bfloat16)
    b2p = jnp.pad(b2f, (0, d_pad - d_hid)).reshape(1, d_pad).astype(jnp.float32)

    kernel = functools.partial(_encoder_kernel, inv_c=1.0 / C, inv_f=1.0 / F, tb=tb)

    out2d = pl.pallas_call(
        kernel,
        out_shape=jax.ShapeDtypeStruct((B * OUT_CH, d_pad), jnp.float32),
        grid_spec=pltpu.PrefetchScalarGridSpec(
            num_scalar_prefetch=0,
            grid=(B // tb,),
            in_specs=[
                pl.BlockSpec((tb, C, F), lambda i: (i, 0, 0)),        # x slab
                pl.BlockSpec((tb, OUT_CH, C), lambda i: (0, 0, 0)),   # w1 (resident)
                pl.BlockSpec((F, d_pad), lambda i: (0, 0)),           # w2 (resident)
                pl.BlockSpec((1, d_pad), lambda i: (0, 0)),           # b2 (resident)
            ],
            out_specs=pl.BlockSpec((tb * OUT_CH, d_pad), lambda i: (i, 0)),
        ),
        compiler_params=pltpu.CompilerParams(
            dimension_semantics=("parallel",),      # batch axis -> shard across TCs
            vmem_limit_bytes=64 * 1024 * 1024,      # > 32 MiB scoped default, <= v7x physical
        ),
    )(x, w1b, w2p, b2p)

    out = out2d.reshape(B, OUT_CH, d_pad)
    return out[:, :, :d_hid] if d_pad != d_hid else out


def init_params(key, num_channel, in_feat, d_hid):
    """Deterministic synthetic parameters in PyTorch (out, in) layout."""
    ks = jax.random.split(key, 8)
    return {
        "w1": jax.random.normal(ks[0], (OUT_CH, num_channel), jnp.float32) * 0.05,
        "b1": jax.random.normal(ks[1], (OUT_CH,), jnp.float32) * 0.05,
        "w2": jax.random.normal(ks[2], (d_hid, in_feat), jnp.float32) * 0.05,
        "b2": jax.random.normal(ks[3], (d_hid,), jnp.float32) * 0.05,
        # non-trivial LN affines so the wrapper-side weight folding is exercised
        "ln1_g": 1.0 + 0.1 * jax.random.normal(ks[4], (num_channel,), jnp.float32),
        "ln1_b": 0.1 * jax.random.normal(ks[5], (num_channel,), jnp.float32),
        "ln2_g": 1.0 + 0.1 * jax.random.normal(ks[6], (in_feat,), jnp.float32),
        "ln2_b": 0.1 * jax.random.normal(ks[7], (in_feat,), jnp.float32),
    }


def _reference(x, params):
    """Pure-JAX f32 reference mirroring the PyTorch forward exactly."""
    def ln(v, g, b):
        mu = jnp.mean(v, -1, keepdims=True)
        var = jnp.mean(jnp.square(v - mu), -1, keepdims=True)
        return (v - mu) / jnp.sqrt(var + LN_EPS) * g + b
    xt = jnp.transpose(x, (0, 2, 1))                              # [B, F, C]
    h = ln(xt, params["ln1_g"], params["ln1_b"]) @ params["w1"].T + params["b1"]
    ht = jnp.transpose(h, (0, 2, 1))                              # [B, 64, F]
    return ln(ht, params["ln2_g"], params["ln2_b"]) @ params["w2"].T + params["b2"]


if __name__ == "__main__":
    # Small shapes consistent with the module ([B, num_channel, in_feat]).
    B, num_channel, in_feat, d_hid = 8, 16, 32, 32

    key = jax.random.PRNGKey(0)
    kx, kp = jax.random.split(key)
    x = jax.random.normal(kx, (B, num_channel, in_feat), jnp.float32)
    params = init_params(kp, num_channel, in_feat, d_hid)

    fwd = jax.jit(lambda xx: encoder_forward(xx, params))
    out = jax.block_until_ready(fwd(x))

    ref = _reference(x, params)
    assert out.shape == (B, OUT_CH, d_hid), out.shape
    # bf16 matmul operands with f32 accumulation -> mixed-precision tolerance
    max_err = float(jnp.max(jnp.abs(out - ref)))
    assert jnp.allclose(out, ref, atol=2e-2, rtol=2e-2), f"mismatch, max_err={max_err}"

    print("KERNEL_OK")
</pallas_src>

<mosaic_0001>
module attributes {stable_mosaic.version = 11 : i64} {
  func.func @_encoder_kernel(%arg0: i32, %arg1: memref<4x16x32xf32, #tpu.memory_space<vmem>>, %arg2: memref<4x64x16xbf16, #tpu.memory_space<vmem>>, %arg3: memref<32x128xbf16, #tpu.memory_space<vmem>>, %arg4: memref<1x128xf32, #tpu.memory_space<vmem>>, %arg5: memref<256x128xf32, #tpu.memory_space<vmem>>) attributes {dimension_semantics = [#tpu.dimension_semantics<parallel>], iteration_bounds = array<i64: 2>, scalar_prefetch = 0 : i64, scratch_operands = 0 : i64, tpu.core_type = #tpu.core_type<tc>, window_params = [{transform_indices = @transform_0, window_bounds = array<i64: 4, 16, 32>}, {pipeline_mode = #tpu.pipeline_mode<synchronous>, transform_indices = @transform_1, window_bounds = array<i64: 4, 64, 16>}, {pipeline_mode = #tpu.pipeline_mode<synchronous>, transform_indices = @transform_2, window_bounds = array<i64: 32, 128>}, {pipeline_mode = #tpu.pipeline_mode<synchronous>, transform_indices = @transform_3, window_bounds = array<i64: 1, 128>}, {transform_indices = @transform_4, window_bounds = array<i64: 256, 128>}]} {
    %c0 = arith.constant 0 : index
    %c0_0 = arith.constant 0 : index
    %c0_1 = arith.constant 0 : index
    %0 = vector.load %arg1[%c0, %c0_0, %c0_1] : memref<4x16x32xf32, #tpu.memory_space<vmem>>, vector<4x16x32xf32>
    %cst = arith.constant dense<0.000000e+00> : vector<4x32xf32>
    %1 = vector.multi_reduction <add>, %0, %cst [1] : vector<4x16x32xf32> to vector<4x32xf32>
    %2 = vector.shape_cast %1 : vector<4x32xf32> to vector<4x1x32xf32>
    %3 = arith.mulf %0, %0 : vector<4x16x32xf32>
    %cst_2 = arith.constant dense<0.000000e+00> : vector<4x32xf32>
    %4 = vector.multi_reduction <add>, %3, %cst_2 [1] : vector<4x16x32xf32> to vector<4x32xf32>
    %5 = vector.shape_cast %4 : vector<4x32xf32> to vector<4x1x32xf32>
    %cst_3 = arith.constant 6.250000e-02 : f32
    %6 = vector.broadcast %cst_3 : f32 to vector<4x1x32xf32>
    %7 = arith.mulf %2, %6 : vector<4x1x32xf32>
    %cst_4 = arith.constant 6.250000e-02 : f32
    %8 = vector.broadcast %cst_4 : f32 to vector<4x1x32xf32>
    %9 = arith.mulf %5, %8 : vector<4x1x32xf32>
    %10 = arith.mulf %7, %7 : vector<4x1x32xf32>
    %11 = arith.subf %9, %10 : vector<4x1x32xf32>
    %cst_5 = arith.constant 0.000000e+00 : f32
    %12 = vector.broadcast %cst_5 : f32 to vector<4x1x32xf32>
    %13 = arith.maximumf %11, %12 : vector<4x1x32xf32>
    %14 = vector.broadcast %7 : vector<4x1x32xf32> to vector<4x16x32xf32>
    %15 = arith.subf %0, %14 : vector<4x16x32xf32>
    %cst_6 = arith.constant 9.99999974E-6 : f32
    %16 = vector.broadcast %cst_6 : f32 to vector<4x1x32xf32>
    %17 = arith.addf %13, %16 : vector<4x1x32xf32>
    %18 = math.rsqrt %17 : vector<4x1x32xf32>
    %19 = vector.broadcast %18 : vector<4x1x32xf32> to vector<4x16x32xf32>
    %20 = arith.mulf %15, %19 : vector<4x16x32xf32>
    %c0_7 = arith.constant 0 : index
    %c0_8 = arith.constant 0 : index
    %c0_9 = arith.constant 0 : index
    %21 = vector.load %arg2[%c0_7, %c0_8, %c0_9] : memref<4x64x16xbf16, #tpu.memory_space<vmem>>, vector<4x64x16xbf16>
    %22 = arith.truncf %20 : vector<4x16x32xf32> to vector<4x16x32xbf16>
    "tpu.trace_start"() <{level = 10 : i32, message = "boc,bcf->bof"}> : () -> ()
    %cst_10 = arith.constant dense<0.000000e+00> : vector<4x64x32xf32>
    %23 = tpu.matmul %21, %22, %cst_10 {dimension_numbers = #tpu.dot_dimension_numbers<[2], [1], [1], [2], [0, 0, 0, 1, 1, 2], [0], [0]>} : vector<4x64x16xbf16>, vector<4x16x32xbf16>, vector<4x64x32xf32> -> vector<4x64x32xf32>
    "tpu.trace_stop"() : () -> ()
    %cst_11 = arith.constant dense<0.000000e+00> : vector<4x64xf32>
    %24 = vector.multi_reduction <add>, %23, %cst_11 [2] : vector<4x64x32xf32> to vector<4x64xf32>
    %25 = vector.shape_cast %24 : vector<4x64xf32> to vector<4x64x1xf32>
    %26 = arith.mulf %23, %23 : vector<4x64x32xf32>
    %cst_12 = arith.constant dense<0.000000e+00> : vector<4x64xf32>
    %27 = vector.multi_reduction <add>, %26, %cst_12 [2] : vector<4x64x32xf32> to vector<4x64xf32>
    %28 = vector.shape_cast %27 : vector<4x64xf32> to vector<4x64x1xf32>
    %cst_13 = arith.constant 3.125000e-02 : f32
    %29 = vector.broadcast %cst_13 : f32 to vector<4x64x1xf32>
    %30 = arith.mulf %25, %29 : vector<4x64x1xf32>
    %cst_14 = arith.constant 3.125000e-02 : f32
    %31 = vector.broadcast %cst_14 : f32 to vector<4x64x1xf32>
    %32 = arith.mulf %28, %31 : vector<4x64x1xf32>
    %33 = arith.mulf %30, %30 : vector<4x64x1xf32>
    %34 = arith.subf %32, %33 : vector<4x64x1xf32>
    %cst_15 = arith.constant 0.000000e+00 : f32
    %35 = vector.broadcast %cst_15 : f32 to vector<4x64x1xf32>
    %36 = arith.maximumf %34, %35 : vector<4x64x1xf32>
    %37 = vector.broadcast %30 : vector<4x64x1xf32> to vector<4x64x32xf32>
    %38 = arith.subf %23, %37 : vector<4x64x32xf32>
    %cst_16 = arith.constant 9.99999974E-6 : f32
    %39 = vector.broadcast %cst_16 : f32 to vector<4x64x1xf32>
    %40 = arith.addf %36, %39 : vector<4x64x1xf32>
    %41 = math.rsqrt %40 : vector<4x64x1xf32>
    %42 = vector.broadcast %41 : vector<4x64x1xf32> to vector<4x64x32xf32>
    %43 = arith.mulf %38, %42 : vector<4x64x32xf32>
    %44 = vector.shape_cast %43 : vector<4x64x32xf32> to vector<256x32xf32>
    %45 = arith.truncf %44 : vector<256x32xf32> to vector<256x32xbf16>
    %c0_17 = arith.constant 0 : index
    %c0_18 = arith.constant 0 : index
    %46 = vector.load %arg3[%c0_17, %c0_18] : memref<32x128xbf16, #tpu.memory_space<vmem>>, vector<32x128xbf16>
    %cst_19 = arith.constant dense<0.000000e+00> : vector<256x128xf32>
    %47 = tpu.matmul %45, %46, %cst_19 {dimension_numbers = #tpu.dot_dimension_numbers<[1], [0], [0], [1], [0, 0, 1, 1], [], []>} : vector<256x32xbf16>, vector<32x128xbf16>, vector<256x128xf32> -> vector<256x128xf32>
    %c0_20 = arith.constant 0 : index
    %c0_21 = arith.constant 0 : index
    %48 = vector.load %arg4[%c0_20, %c0_21] : memref<1x128xf32, #tpu.memory_space<vmem>>, vector<1x128xf32>
    %49 = vector.broadcast %48 : vector<1x128xf32> to vector<256x128xf32>
    %50 = arith.addf %47, %49 : vector<256x128xf32>
    %c0_22 = arith.constant 0 : index
    %c0_23 = arith.constant 0 : index
    %51 = vector.load %arg5[%c0_22, %c0_23] : memref<256x128xf32, #tpu.memory_space<vmem>>, vector<256x128xf32>
    tpu.vector_store %arg5[%c0_22, %c0_23], %50 {strides = array<i32>} : memref<256x128xf32, #tpu.memory_space<vmem>>, vector<256x128xf32>,
    return
  }
  func.func @transform_0(%arg0: i32) -> (i32, i32, i32) {
    %c0_i32 = arith.constant 0 : i32
    %c0_i32_0 = arith.constant 0 : i32
    %c0_i32_1 = arith.constant 0 : i32
    return %arg0, %c0_i32, %c0_i32_0 : i32, i32, i32
  }
  func.func @transform_1(%arg0: i32) -> (i32, i32, i32) {
    %c0_i32 = arith.constant 0 : i32
    %c0_i32_0 = arith.constant 0 : i32
    %c0_i32_1 = arith.constant 0 : i32
    %c0_i32_2 = arith.constant 0 : i32
    return %c0_i32, %c0_i32_0, %c0_i32_1 : i32, i32, i32
  }
  func.func @transform_2(%arg0: i32) -> (i32, i32) {
    %c0_i32 = arith.constant 0 : i32
    %c0_i32_0 = arith.constant 0 : i32
    %c0_i32_1 = arith.constant 0 : i32
    return %c0_i32, %c0_i32_0 : i32, i32
  }
  func.func @transform_3(%arg0: i32) -> (i32, i32) {
    %c0_i32 = arith.constant 0 : i32
    %c0_i32_0 = arith.constant 0 : i32
    %c0_i32_1 = arith.constant 0 : i32
    return %c0_i32, %c0_i32_0 : i32, i32
  }
  func.func @transform_4(%arg0: i32) -> (i32, i32) {
    %c0_i32 = arith.constant 0 : i32
    %c0_i32_0 = arith.constant 0 : i32
    return %arg0, %c0_i32 : i32, i32
  }
}

</mosaic_0001>

<bundles_post_ra>
// kernel: _lambda_.1
= control target key start
LH: loop header
LB: loop body
LE: loop exit
PB: predicated region body
PF: predicated region fallthrough
CT: control target
= control target key end

     0   :  { %9 = vsyncpa [#allocation3], 0  ;;  %s3218_s0 = inlined_call_operand.hbm [shape: f32[8,16,32], index: 0, kind: input, shape index: {}]   ;;  %s3219_s1 = inlined_call_operand.hbm [shape: bf16[4,64,16], index: 1, kind: input, shape index: {}]   ;;  %s3220_s2 = inlined_call_operand.hbm [shape: bf16[32,128], index: 2, kind: input, shape index: {}]   ;;  %s3221_s3 = inlined_call_operand.hbm [shape: f32[1,128], index: 3, kind: input, shape index: {}]   ;;  %s3222_s4 = inlined_call_operand.hbm [shape: f32[512,128], index: 4, kind: output, shape index: {}]  }
   0x1   :  { %11 = vsyncpa [#allocation3 + $0x1], 0 }
   0x2   :  { %12 = vsyncpa [#allocation6], 0 }
   0x3   :  { %13 = vsyncpa [#allocation9], 0 }
   0x4   :  { %14 = vsyncpa [#allocation4], 0 }
   0x5   :  { %16 = vsyncpa [#allocation4 + $0x1], 0  ;;  %s2320_s15 = smov 0   ;;  %s2322_s16 = smov 0  }
   0x6   :  { %s2324_s17 = smov 0   ;;  %s2326_s18 = smov 0  }
   0x7 LB: > { %s2341_s19 = sadd.s32 4294967295, %s2282_s18   ;;  %s1728_s20 = sadd.s32 4294967294, %s2282_s18   ;;  %s2282_s18 = sphi %s2326_s18, %s3248_s18   ;;  %s2278_s17 = sphi %s2324_s17, %s3247_s17   ;;  %s2274_s16 = sphi %s2322_s16, %s3246_s16   ;;  %s2270_s15 = sphi %s2320_s15, %s3245_s15  }
   0x8   : > { %p42_p0 = scmp.ne.s32.totalorder %s2274_s16, %s2270_s15  ;;  %p3223_p1 = scmp.eq.s32.totalorder %s2341_s19, 0 }
   0x9   : > { %p135_p3 = scmp.eq.s32.totalorder %s1728_s20, 1  ;;  %p1729_p5 = scmp.ge.s32.totalorder %s2282_s18, 1 }
   0xa   : > { %p2350_p4 = por %p3223_p1, %p42_p0  ;;  %p142_p7 = scmp.lt.s32.totalorder %s2282_s18, 3 }
   0xb   : > { %p2355_p6 = por %p135_p3, %p42_p0  ;;  %s2284_s24 = smov [#allocation5]  }
   0xc   : > { %s3226_s21 = scalar_select %p2350_p4, 1, 0 }
   0xd   : > { %s3227_s22 = scalar_select %p2355_p6, 1, 0 }
   0xe   : > { %p2360_p8 = pnand %p1729_p5, %p142_p7  ;;  %s154_s25 = sshll.u32 %s2284_s24, 4  ;;  %s2364_s25 = int_to_ptr.vmem [resolvable:$true] %s154_s25 }
   0xf   : > { %s2285_s27 = smov [#allocation7]   ;;  %s2286_s29 = smov [#allocation8]  }
  0x10   : > { %s3228_s23 = scalar_select %p2360_p8, 1, 0 }
  0x11   : > { %p1937_p9 = pneg %p2360_p8  ;;  %s167_s28 = sshll.u32 %s2285_s27, 4  ;;  %s2375_s28 = int_to_ptr.vmem [resolvable:$true] %s167_s28 }
  0x12   : > { %s2377_s30 = sshll.u32 %s2286_s29, 4  ;;  %s2094_s7 = scalar_lea.hbm %s3219_s1, 2048  ;;  %s182_s30 = int_to_ptr.vmem [resolvable:$true] %s2377_s30 }
  0x13   : > { %p2371_p11 = pnand %p1937_p9, %p3223_p1  ;;  %p2095_p12 = scmp.ne.s32.totalorder %s3219_s1, %s2094_s7 }
  0x14   : > { %p2101_p5 = scmp.lt.u32.totalorder %s2094_s7, %s3219_s1 }
  0x15   : > { %p2387_p13 = pneg %p2371_p11 }
  0x17   : > { %p2097_p0 = pnand %p2387_p13, %p2095_p12 }
  0x19   : > { %p2098_p3 = pneg %p2097_p0 }
  0x1b   : > { %p2103_p7 = pnand %p2101_p5, %p2098_p3 }
  0x1d   : > { %2106 = shalt.err (!%p2103_p7)
}
  0x1e   : > { %s2107_s13 = scalar_lea.vmem %s2364_s25, 2048  ;;  %p2115_p2 = scmp.lt.s32.totalorder %s2364_s25, %s2364_s25 }
  0x1f   : > { %p2108_p9 = scmp.ne.s32.totalorder %s2364_s25, %s2107_s13  ;;  %p2116_p6 = scmp.lt.s32.totalorder %s2107_s13, %s2107_s13 }
  0x21   : > { %p2110_p10 = pnand %p2108_p9, %p2387_p13  ;;  %p2117_p12 = por %p2116_p6, %p2115_p2 }
  0x23   : > { %p2111_p1 = pneg %p2110_p10 }
  0x25   : > { %p2118_p0 = pnand %p2117_p12, %p2111_p1 }
  0x27   : > { %2121 = shalt.err (!%p2118_p0)
}
  0x28   : > { %s2287_s14 = smov 64   ;;  %s2288_s20 = smov 4  }
  0x29   : > { %1940 = dma.hbm_to_vmem [thread:$0]  (!%p2371_p11), %s3219_s1, 2048, %s2364_s25, [#allocation6], %s2287_s14, %s2287_s14, %s2288_s20  }
  0x2a   : > { %s2122_s6 = scalar_lea.hbm %s3220_s2, 256 }
  0x2b   : > { %p2123_p2 = scmp.ne.s32.totalorder %s3220_s2, %s2122_s6  ;;  %p2129_p10 = scmp.lt.u32.totalorder %s2122_s6, %s3220_s2 }
  0x2d   : > { %p2125_p1 = pnand %p2123_p2, %p2387_p13 }
  0x2f   : > { %p2126_p6 = pneg %p2125_p1 }
  0x31   : > { %p2131_p3 = pnand %p2129_p10, %p2126_p6 }
  0x33   : > { %2134 = shalt.err (!%p2131_p3)
}
  0x34   : > { %s2135_s25 = scalar_lea.vmem %s2375_s28, 256  ;;  %p2143_p12 = scmp.lt.s32.totalorder %s2375_s28, %s2375_s28 }
  0x35   : > { %p2136_p5 = scmp.ne.s32.totalorder %s2375_s28, %s2135_s25  ;;  %p2144_p0 = scmp.lt.s32.totalorder %s2135_s25, %s2135_s25 }
  0x37   : > { %p2138_p7 = pnand %p2136_p5, %p2387_p13  ;;  %p2145_p2 = por %p2144_p0, %p2143_p12 }
  0x39   : > { %p2139_p9 = pneg %p2138_p7 }
  0x3b   : > { %p2146_p1 = pnand %p2145_p2, %p2139_p9 }
  0x3d   : > { %2149 = shalt.err (!%p2146_p1)
}
  0x3e   : > { %1943 = dma.hbm_to_vmem [thread:$0]  (!%p2371_p11), %s3220_s2, 256, %s2375_s28, [#allocation6], %s2287_s14, %s2287_s14, %s2288_s20  }
  0x3f   : > { %s2150_s29 = scalar_lea.hbm %s3221_s3, 16 }
  0x40   : > { %p2151_p6 = scmp.ne.s32.totalorder %s3221_s3, %s2150_s29  ;;  %p2157_p5 = scmp.lt.u32.totalorder %s2150_s29, %s3221_s3 }
  0x42   : > { %p2153_p10 = pnand %p2151_p6, %p2387_p13 }
  0x44   : > { %p2154_p3 = pneg %p2153_p10 }
  0x46   : > { %p2159_p7 = pnand %p2157_p5, %p2154_p3 }
  0x48   : > { %2162 = shalt.err (!%p2159_p7)
}
  0x49   : > { %s2163_s9 = scalar_lea.vmem %s182_s30, 16  ;;  %s2170_s28 = scalar_lea.vmem %s182_s30, 32 }
  0x4a   : > { %p2164_p9 = scmp.ne.s32.totalorder %s182_s30, %s2163_s9  ;;  %p2171_p2 = scmp.lt.s32.totalorder %s182_s30, %s182_s30 }
  0x4b   : > { %p2172_p1 = scmp.lt.s32.totalorder %s2170_s28, %s2163_s9 }
  0x4c   : > { %p2166_p12 = pnand %p2164_p9, %p2387_p13 }
  0x4d   : > { %p2173_p4 = por %p2172_p1, %p2171_p2 }
  0x4e   : > { %p2167_p0 = pneg %p2166_p12 }
  0x50   : > { %p2174_p8 = pnand %p2173_p4, %p2167_p0 }
  0x52   : > { %2177 = shalt.err (!%p2174_p8)
}
  0x53   : > { %1946 = dma.hbm_to_vmem [thread:$0]  (!%p2371_p11), %s3221_s3, 16, %s182_s30, [#allocation9]  }
  0x54   : > { %s2451_s10 = sadd.s32 1, %s2282_s18   ;;  %s29_s26 = sadd.s32 1, %s2278_s17 }
  0x55   : > { %s26_s11 = ssub.s32 %s2282_s18, %s2451_s10  ;;  %p36_p8 = scmp.ne.s32.totalorder %s2278_s17, %s2274_s16 }
  0x56   : > { %p27_p4 = scmp.eq.s32.totalorder %s26_s11, 0  ;;  %p37_p13 = scmp.eq.s32.totalorder %s2282_s18, 0 }
  0x57   : > { %p1958_p6 = scmp.lt.s32.totalorder %s2282_s18, 2  ;;  %p3231_p3 = scmp.eq.s32.totalorder %s2341_s19, 1 }
  0x58   : > { %s2461_s25 = scalar_select %p27_p4, %s2278_s17, %s29_s26  }
  0x59   : > { %p38_p10 = por %p37_p13, %p36_p8  ;;  %p2465_p5 = por %p3231_p3, %p36_p8 }
  0x5a   : > { %s192_s13 = sand.u32 1, %s2278_s17   ;;  %s1801_s24 = sshll.u32 %s2282_s18, 10 }
  0x5b   : > { %s1734_s30 = sshll.u32 %s192_s13, 6  ;;  %s2474_s5 = scalar_lea.hbm %s3218_s0, %s1801_s24 }
  0x5c   : > { %s196_s6 = scalar_lea.vmem [#allocation2], %s1734_s30  ;;  %p2476_p11 = pnand %p1958_p6, %p38_p10 }
  0x5d   : > { %s204_s7 = sshll.u32 %s196_s6, 4  ;;  %s2482_s9 = scalar_lea.sflag [#allocation3], %s192_s13  ;;  %s2480_s7 = int_to_ptr.vmem [resolvable:$true] %s204_s7 }
  0x5e   : > { %s2178_s28 = scalar_lea.hbm %s2474_s5, 1024  ;;  %p2180_p9 = pneg %p2476_p11 }
  0x5f   : > { %p2179_p7 = scmp.ne.s32.totalorder %s2474_s5, %s2178_s28  ;;  %s2183_s11 = scalar_lea.hbm %s3218_s0, 2048 }
  0x60   : > { %p2184_p2 = scmp.lt.u32.totalorder %s2474_s5, %s3218_s0  ;;  %p2185_p1 = scmp.lt.u32.totalorder %s2183_s11, %s2178_s28 }
  0x61   : > { %p2181_p12 = pnand %p2180_p9, %p2179_p7  ;;  %p2187_p8 = scmp.lt.u32.totalorder %s2178_s28, %s2474_s5 }
  0x62   : > { %p2186_p4 = por %p2185_p1, %p2184_p2 }
  0x63   : > { %p2182_p0 = pneg %p2181_p12 }
  0x64   : > { %p2188_p13 = por %p2187_p8, %p2186_p4 }
  0x66   : > { %p2189_p6 = pnand %p2188_p13, %p2182_p0 }
  0x68   : > { %2192 = shalt.err (!%p2189_p6)
}
  0x69   : > { %s2193_s13 = scalar_lea.vmem %s2480_s7, 1024  ;;  %s2289_s30 = smov [#allocation2]  }
  0x6a   : > { %p2194_p10 = scmp.ne.s32.totalorder %s2480_s7, %s2193_s13  ;;  %s2198_s27 = sshll.u32 %s2289_s30, 4  ;;  %s2199_s27 = int_to_ptr.vmem [resolvable:$false] %s2198_s27 }
  0x6b   : > { %s2200_s29 = scalar_lea.vmem %s2199_s27, 2048  ;;  %p2201_p12 = scmp.lt.s32.totalorder %s2480_s7, %s2199_s27 }
  0x6c   : > { %p2196_p3 = pnand %p2194_p10, %p2180_p9  ;;  %p2202_p2 = scmp.lt.s32.totalorder %s2200_s29, %s2193_s13 }
  0x6e   : > { %p2197_p7 = pneg %p2196_p3  ;;  %p2203_p1 = por %p2202_p2, %p2201_p12 }
  0x70   : > { %p2204_p4 = pnand %p2203_p1, %p2197_p7 }
  0x72   : > { %2207 = shalt.err (!%p2204_p4)
}
  0x73   : > { %s2290_s6 = smov 128   ;;  %s2291_s28 = smov 8  }
  0x74   : > { %1950 = dma.hbm_to_vmem [thread:$0]  (!%p2476_p11), %s2474_s5, 1024, %s2480_s7, %s2482_s9, %s2290_s6, %s2290_s6, %s2291_s28  }
  0x75   : > { %p3234_p9 = scmp.ne.s32.totalorder %s3228_s23, 0 }
  0x76   : > { %s2513_s14 = sand.u32 (!%p3234_p9), 1, %s2274_s16   ;;  %p3235_p0 = scmp.ne.s32.totalorder (!%p3234_p9), %s3226_s21, 0 }
  0x77   : > { %216 = sbr.rel (%p3234_p9) target bundleno = 915 (0x393), region = 36  ;;  %s1739_s20 = sshll.u32 (!%p3234_p9), %s2513_s14, 6 }
  0x78   : > { %s219_s11 = scalar_lea.sflag (!%p3234_p9), [#allocation3], %s2513_s14  ;;  %s2517_s26 = scalar_lea.vmem (!%p3234_p9), [#allocation2], %s1739_s20 }
  0x7e   : > { %2253 = dma.done.wait (%p3235_p0), %s219_s11, 1024  }
  0x7f   : > { %2255 = vsyncadd (%p3235_p0), %s219_s11, 4294966272  ;;  %p3236_p11 = scmp.eq.s32.totalorder %s2341_s19, 0 }
  0x81   : > { %2257 = dma.done.wait (%p3236_p11), [#allocation6], 2304   ;;  %p3237_p8 = pmov %p3236_p11 }
  0x83   : > { %2259 = vsyncadd (%p3237_p8), [#allocation6], 4294964992  ;;  %p3238_p13 = pmov %p3237_p8 }
  0x84   : > { %p3239_p6 = pmov %p3237_p8 }
  0x85   : > { %2261 = dma.done.wait (%p3238_p13), [#allocation9], 16  }
  0x86   : > { %2263 = vsyncadd (%p3239_p6), [#allocation9], 4294967280  ;;  %vm270_vm0 = vcmask 261120   ;;  %v2532_v0 = vld [vmem:[%s2517_s26] sm:$0xff]  ;;  %v2535_v1 = vld [vmem:[%s2517_s26 + $0x8] sm:$0xff]  ;;  %vm451_vm1 = vcmask 130048  }
  0x87   : > { %v2538_v2 = vld [vmem:[%s2517_s26 + $0x10] sm:$0xff]  ;;  %v271_v3 = vsel %vm270_vm0, %v2532_v0, 0.0  ;;  %v272_v4 = vsel %vm270_vm0, %v2535_v1, 0.0  ;;  %v307_v5 = vmul.f32 %v2532_v0, %v2532_v0  ;;  %v308_v6 = vmul.f32 %v2535_v1, %v2535_v1  ;;  %v2549_v7 = vld [vmem:[%s2517_s26 + $0x18] sm:$0xff]  ;;  %v2004_v8 = vld [vmem:[#allocation5] sm:$0xff]   ;;  %s1743_s21 = sshll.u32 %s2513_s14, 8 }
  0x88   : > { %v273_v9 = vadd.f32 %v272_v4, %v271_v3  ;;  %v280_v10 = vsel %vm270_vm0, %v2538_v2, 0.0  ;;  %v281_v11 = vsel %vm270_vm0, %v2549_v7, 0.0  ;;  %v309_v12 = vmul.f32 %v2538_v2, %v2538_v2  ;;  %1843 = vmatprep.mubr.msk.bf16.mxu0 %vm451_vm1, %v2004_v8  ;;  %v2006_v17 = vld [vmem:[#allocation5 + $0x20] sm:$0xff]   ;;  %v2569_v35 = vld [vmem:[%s2517_s26 + $0x28] sm:$0xff]  ;;  %v2578_v40 = vld [vmem:[%s2517_s26 + $0x30] sm:$0xff]  ;;  %s3103_s23 = scalar_lea.vmem [#allocation10], %s1743_s21 }
  0x89   : > { %v315_v13 = vsel %vm270_vm0, %v307_v5, 0.0  ;;  %v316_v14 = vsel %vm270_vm0, %v308_v6, 0.0  ;;  %v282_v15 = vadd.f32 %v281_v11, %v280_v10  ;;  %v310_v16 = vmul.f32 %v2549_v7, %v2549_v7  ;;  %1853 = vmatprep.mubr.msk.bf16.mxu1 %vm451_vm1, %v2006_v17  ;;  %v2566_v34 = vld [vmem:[%s2517_s26 + $0x20] sm:$0xff]  ;;  %v2581_v45 = vld [vmem:[%s2517_s26 + $0x38] sm:$0xff]  ;;  %s1802_s5 = sshll.u32 %s2341_s19, 12  ;;  %s1626_s7 = sshll.u32 %s3103_s23, 4  ;;  %s3170_s7 = int_to_ptr.vmem [resolvable:$true] %s1626_s7 }
  0x8a   : > { %v274_v18 = vrot.slane %v273_v9, 4  ;;  %v317_v19 = vadd.f32 %v316_v14, %v315_v13  ;;  %v324_v20 = vsel %vm270_vm0, %v309_v12, 0.0  ;;  %v289_v37 = vsel %vm270_vm0, %v2566_v34, 0.0  ;;  %s3168_s24 = scalar_lea.hbm %s3222_s4, %s1802_s5  ;;  %s1613_s19 = scalar_lea.sflag [#allocation4], %s2513_s14 }
  0x8b   : > { %v283_v21 = vrot.slane %v282_v15, 4  ;;  %v325_v22 = vsel %vm270_vm0, %v310_v16, 0.0  ;;  %v290_v38 = vsel %vm270_vm0, %v2569_v35, 0.0  ;;  %v311_v39 = vmul.f32 %v2566_v34, %v2566_v34  ;;  %s2208_s13 = scalar_lea.vmem %s3170_s7, 4096  ;;  %s2292_s30 = smov [#allocation10]  }
  0x8c   : > { %v275_v23 = vadd.f32 %v274_v18, %v273_v9  ;;  %v318_v24 = vrot.slane %v317_v19, 4  ;;  %v326_v25 = vadd.f32 %v325_v22, %v324_v20  ;;  %v291_v44 = vadd.f32 %v290_v38, %v289_v37  ;;  %p2209_p10 = scmp.ne.s32.totalorder %s3170_s7, %s2208_s13  ;;  %s2212_s27 = sshll.u32 %s2292_s30, 4  ;;  %s2213_s27 = int_to_ptr.vmem [resolvable:$false] %s2212_s27 }
  0x8d   : > { %v284_v26 = vadd.f32 %v283_v21, %v282_v15  ;;  %v312_v47 = vmul.f32 %v2569_v35, %v2569_v35  ;;  %v333_v48 = vsel %vm270_vm0, %v311_v39, 0.0  ;;  %v298_v49 = vsel %vm270_vm0, %v2578_v40, 0.0  ;;  %s2214_s29 = scalar_lea.vmem %s2213_s27, 8192  ;;  %p2215_p12 = scmp.lt.s32.totalorder %s3170_s7, %s2213_s27 }
  0x8e   : > { %v276_v27 = vrot.slane %v275_v23, 2  ;;  %v319_v28 = vadd.f32 %v318_v24, %v317_v19  ;;  %v327_v29 = vrot.slane %v326_v25, 4  ;;  %v292_v53 = vrot.slane %v291_v44, 4  ;;  %p2210_p3 = pnand %p2209_p10, %p2465_p5  ;;  %p2216_p2 = scmp.lt.s32.totalorder %s2214_s29, %s2208_s13 }
  0x8f   : > { %v285_v30 = vrot.slane %v284_v26, 2  ;;  %v334_v55 = vsel %vm270_vm0, %v312_v47, 0.0  ;;  %v299_v56 = vsel %vm270_vm0, %v2581_v45, 0.0  ;;  %v313_v57 = vmul.f32 %v2578_v40, %v2578_v40 }
  0x90   : > { %v277_v31 = vadd.f32 %v276_v27, %v275_v23  ;;  %v320_v32 = vrot.slane %v319_v28, 2  ;;  %v328_v33 = vadd.f32 %v327_v29, %v326_v25  ;;  %v293_v61 = vadd.f32 %v292_v53, %v291_v44  ;;  %p2211_p7 = pneg %p2210_p3  ;;  %p2217_p1 = por %p2216_p2, %p2215_p12 }
  0x91   : > { %v286_v36 = vadd.f32 %v285_v30, %v284_v26  ;;  %v335_v63 = vadd.f32 %v334_v55, %v333_v48  ;;  %v300_v3 = vadd.f32 %v299_v56, %v298_v49  ;;  %v314_v4 = vmul.f32 %v2581_v45, %v2581_v45 }
  0x92   : > { %v278_v41 = vrot.slane %v277_v31, 1  ;;  %v321_v42 = vadd.f32 %v320_v32, %v319_v28  ;;  %v329_v43 = vrot.slane %v328_v33, 2  ;;  %v294_v11 = vrot.slane %v293_v61, 2  ;;  %p2218_p4 = pnand %p2217_p1, %p2211_p7 }
  0x93   : > { %v287_v46 = vrot.slane %v286_v36, 1  ;;  %v336_v12 = vrot.slane %v335_v63, 4  ;;  %v301_v13 = vrot.slane %v300_v3, 4  ;;  %v342_v15 = vsel %vm270_vm0, %v313_v57, 0.0 }
  0x94   : > { %v279_v50 = vadd.f32 %v278_v41, %v277_v31  ;;  %v322_v51 = vrot.slane %v321_v42, 1  ;;  %v330_v52 = vadd.f32 %v329_v43, %v328_v33  ;;  %v343_v16 = vsel %vm270_vm0, %v314_v4, 0.0 }
  0x95   : > { %v288_v54 = vadd.f32 %v287_v46, %v286_v36  ;;  %v295_v18 = vadd.f32 %v294_v11, %v293_v61  ;;  %v337_v19 = vadd.f32 %v336_v12, %v335_v63  ;;  %v302_v20 = vadd.f32 %v301_v13, %v300_v3  ;;  %v2009_v12 = vld [vmem:[#allocation5 + $0x18] sm:$0xff]  }
  0x96   : > { %v323_v58 = vadd.f32 %v322_v51, %v321_v42  ;;  %v351_v59 = vmul.f32 0.0625, %v279_v50  ;;  %v331_v60 = vrot.slane %v330_v52, 1  ;;  %v344_v22 = vadd.f32 %v343_v16, %v342_v15 }
  0x97   : > { %v2593_v62 = vmul.f32 0.0625, %v288_v54  ;;  %v296_v24 = vrot.slane %v295_v18, 1  ;;  %v338_v25 = vrot.slane %v337_v19, 2  ;;  %v303_v26 = vrot.slane %v302_v20, 2 }
  0x98   : > { %v355_v5 = vmul.f32 0.0625, %v323_v58  ;;  %v359_v6 = vmul.f32 %v351_v59, %v351_v59  ;;  %v332_v8 = vadd.f32 %v331_v60, %v330_v52  ;;  %v345_v28 = vrot.slane %v344_v22, 4 }
  0x99   : > { %v360_v9 = vmul.f32 %v2593_v62, %v2593_v62  ;;  %v297_v29 = vadd.f32 %v296_v24, %v295_v18  ;;  %v339_v30 = vadd.f32 %v338_v25, %v337_v19  ;;  %v304_v31 = vadd.f32 %v303_v26, %v302_v20  ;;  %v2018_v25 = vld [vmem:[#allocation5 + $0x70] sm:$0xff]   ;;  %v2017_v26 = vld [vmem:[#allocation5 + $0x58] sm:$0xff]  }
  0x9a   : > { %v363_v10 = vsub.f32 %v355_v5, %v359_v6  ;;  %v356_v14 = vmul.f32 0.0625, %v332_v8  ;;  %v346_v33 = vadd.f32 %v345_v28, %v344_v22  ;;  %v371_v47 = vsub.f32 %v2532_v0, %v351_v59  ;;  %v2005_v5 = vld [vmem:[#allocation5 + $0x8] sm:$0xff]  }
  0x9b   : > { %v340_v36 = vrot.slane %v339_v30, 1  ;;  %v353_v37 = vmul.f32 0.0625, %v297_v29  ;;  %v305_v38 = vrot.slane %v304_v31, 1  ;;  %v372_v48 = vsub.f32 %v2535_v1, %v351_v59 }
  0x9c   : > { %v367_v17 = vmax.f32 %v363_v10, 0.0  ;;  %v364_v21 = vsub.f32 %v356_v14, %v360_v9  ;;  %v347_v39 = vrot.slane %v346_v33, 2  ;;  %v373_v55 = vsub.f32 %v2538_v2, %v2593_v62  ;;  %v2008_v2 = vld [vmem:[#allocation5 + $0x10] sm:$0xff]   ;;  %v2012_v14 = vld [vmem:[#allocation5 + $0x40] sm:$0xff]  }
  0x9d   : > { %v341_v41 = vadd.f32 %v340_v36, %v339_v30  ;;  %v361_v42 = vmul.f32 %v353_v37, %v353_v37  ;;  %v306_v43 = vadd.f32 %v305_v38, %v304_v31  ;;  %v374_v56 = vsub.f32 %v2549_v7, %v2593_v62  ;;  %v2007_v7 = vld [vmem:[#allocation5 + $0x28] sm:$0xff]   ;;  %v2010_v62 = vld [vmem:[#allocation5 + $0x30] sm:$0xff]  }
  0x9e   : > { %v379_v23 = vadd.f32 1e-05, %v367_v17  ;;  %v368_v27 = vmax.f32 %v364_v21, 0.0  ;;  %v348_v44 = vadd.f32 %v347_v39, %v346_v33  ;;  %v375_v10 = vsub.f32 %v2566_v34, %v353_v37  ;;  %v2011_v17 = vld [vmem:[#allocation5 + $0x38] sm:$0xff]   ;;  %v2014_v34 = vld [vmem:[#allocation5 + $0x60] sm:$0xff]  }
  0x9f   : > { %v357_v46 = vmul.f32 0.0625, %v341_v41  ;;  %v354_v50 = vmul.f32 0.0625, %v306_v43  ;;  %v376_v11 = vsub.f32 %v2569_v35, %v353_v37 }
  0xa0   : > { %2022 = vrsqrt.f32 %v379_v23  ;;  %v380_v32 = vadd.f32 1e-05, %v368_v27  ;;  %v349_v49 = vrot.slane %v348_v44, 1  ;;  %v2013_v23 = vld [vmem:[#allocation5 + $0x48] sm:$0xff]   ;;  %v2019_v27 = vld [vmem:[#allocation5 + $0x78] sm:$0xff]  }
  0xa1   : > { %v365_v51 = vsub.f32 %v357_v46, %v361_v42  ;;  %v362_v53 = vmul.f32 %v354_v50, %v354_v50  ;;  %v377_v18 = vsub.f32 %v2578_v40, %v354_v50  ;;  %v378_v19 = vsub.f32 %v2581_v45, %v354_v50  ;;  %v2016_v40 = vld [vmem:[#allocation5 + $0x50] sm:$0xff]   ;;  %v2015_v45 = vld [vmem:[#allocation5 + $0x68] sm:$0xff]  }
  0xa2   : > { %2024 = vrsqrt.f32 %v380_v32  ;;  %v350_v52 = vadd.f32 %v349_v49, %v348_v44 }
  0xa3   : > { %v369_v57 = vmax.f32 %v365_v51, 0.0 }
  0xa4   : > { %v358_v61 = vmul.f32 0.0625, %v350_v52 }
  0xa5   : > { %v381_v63 = vadd.f32 1e-05, %v369_v57 }
  0xa6   : > { %v366_v1 = vsub.f32 %v358_v61, %v362_v53 }
  0xa7   : > { %2026 = vrsqrt.f32 %v381_v63 }
  0xa8   : > { %v370_v6 = vmax.f32 %v366_v1, 0.0 }
  0xaa   : > { %v2023_v54 = vpop.eup %2022  ;;  %v382_v9 = vadd.f32 1e-05, %v370_v6 }
  0xab   : > { %v387_v58 = vmul.f32 %v2023_v54, %v371_v47  ;;  %v388_v60 = vmul.f32 %v2023_v54, %v372_v48 }
  0xac   : > { %v2025_v0 = vpop.eup %2024  ;;  %2028 = vrsqrt.f32 %v382_v9 }
  0xad   : > { %v427_v3 = vpack.c.bf16 %v388_v60, %v387_v58  ;;  %v389_v59 = vmul.f32 %v2025_v0, %v373_v55  ;;  %v390_v4 = vmul.f32 %v2025_v0, %v374_v56 }
  0xaf   : > { %1841 = vmatprep.subr.bf16.mxu0 %v427_v3  ;;  %v428_v8 = vpack.c.bf16 %v390_v4, %v389_v59 }
  0xb0   : > { %1842 = vmatpush3.bf16.msra.mxu0 %v427_v3 }
  0xb1   : > { %1851 = vmatprep.subr.bf16.mxu1 %v428_v8  ;;  %v2027_v13 = vpop.eup %2026 }
  0xb2   : > { %1852 = vmatpush3.bf16.msra.mxu1 %v428_v8  ;;  %v391_v15 = vmul.f32 %v2027_v13, %v375_v10  ;;  %v392_v16 = vmul.f32 %v2027_v13, %v376_v11 }
  0xb3   : > { %1844 = vmatmul.mubr.msk.bf16.vlgmr.msra.gmra.mrb[0].mxu0 %vm451_vm1, %v2005_v5 }
  0xb4   : > { %1847 = vmatprep.mubr.msk.bf16.mxu0 %vm451_vm1, %v2008_v2  ;;  %v429_v20 = vpack.c.bf16 %v392_v16, %v391_v15 }
  0xb5   : > { %1854 = vmatmul.mubr.msk.bf16.vlgmr.msra.gmra.mrb[0].mxu1 %vm451_vm1, %v2007_v7 }
  0xb6   : > { %1857 = vmatprep.mubr.msk.bf16.mxu1 %vm451_vm1, %v2010_v62  ;;  %v2029_v35 = vpop.eup %2028  ;;  %1861 = vmatprep.subr.bf16.mxu0 %v429_v20 }
  0xb7   : > { %1862 = vmatpush3.bf16.msra.mxu0 %v429_v20  ;;  %v393_v21 = vmul.f32 %v2029_v35, %v377_v18  ;;  %v394_v22 = vmul.f32 %v2029_v35, %v378_v19 }
  0xb9   : > { %v430_v24 = vpack.c.bf16 %v394_v22, %v393_v21 }
  0xbb   : > { %1848 = vmatmul.mubr.msk.bf16.gmra.mrb[4].mxu0 %vm451_vm1, %v2009_v12  ;;  %1871 = vmatprep.subr.bf16.mxu1 %v430_v24 }
  0xbc   : > { %1863 = vmatprep.mubr.msk.bf16.mxu0 %vm451_vm1, %v2012_v14  ;;  %1872 = vmatpush3.bf16.msra.mxu1 %v430_v24 }
  0xbd   : > { %1858 = vmatmul.mubr.msk.bf16.gmra.mrb[4].mxu1 %vm451_vm1, %v2011_v17 }
  0xbe   : > { %1873 = vmatprep.mubr.msk.bf16.mxu1 %vm451_vm1, %v2014_v34 }
  0xc3   : > { %1864 = vmatmul.mubr.msk.bf16.vlgmr.msra.gmra.mrb[8].mxu0 %vm451_vm1, %v2013_v23 }
  0xc4   : > { %1867 = vmatprep.mubr.msk.bf16.mxu0 %vm451_vm1, %v2016_v40 }
  0xc5   : > { %1874 = vmatmul.mubr.msk.bf16.vlgmr.msra.gmra.mrb[8].mxu1 %vm451_vm1, %v2015_v45 }
  0xc6   : > { %1877 = vmatprep.mubr.msk.bf16.mxu1 %vm451_vm1, %v2018_v25 }
  0xcb   : > { %1868 = vmatmul.mubr.msk.bf16.gmra.mrb[12].mxu0 %vm451_vm1, %v2017_v26 }
  0xcd   : > { %1878 = vmatmul.mubr.msk.bf16.gmra.mrb[12].mxu1 %vm451_vm1, %v2019_v27 }
 0x186   : > { %v2625_v28 = vpop.f32.mrb[0].mxu0 }
 0x187   : > { %v2627_v29 = vpop.f32.mrb[1].mxu0  ;;  %v826_v30 = vsel %vm270_vm0, %v2625_v28, 0.0  ;;  %v918_v54 = vmul.f32 %v2625_v28, %v2625_v28 }
 0x188   : > { %827 = vadd.xlane.f32.xlu0 %v826_v30  ;;  %v2631_v31 = vpop.f32.mrb[2].mxu0  ;;  %v2633_v32 = vpop.f32.mrb[0].mxu1  ;;  %v820_v44 = vsel %vm270_vm0, %v2627_v29, 0.0  ;;  %v916_v12 = vmul.f32 %v2627_v29, %v2627_v29 }
 0x189   : > { %v2635_v33 = vpop.f32.mrb[3].mxu0  ;;  %v829_v36 = vsel %vm270_vm0, %v2631_v31, 0.0  ;;  %v2639_v37 = vpop.f32.mrb[1].mxu1  ;;  %v850_v38 = vsel %vm270_vm0, %v2633_v32, 0.0  ;;  %v919_v49 = vmul.f32 %v2631_v31, %v2631_v31  ;;  %v954_v61 = vsel %vm270_vm0, %v918_v54, 0.0 }
 0x18a   : > { %830 = vadd.xlane.f32.xlu1 %v829_v36  ;;  %v2643_v39 = vpop.f32.mrb[2].mxu1  ;;  %v844_v53 = vsel %vm270_vm0, %v2639_v37, 0.0  ;;  %v926_v63 = vmul.f32 %v2633_v32, %v2633_v32  ;;  %v917_v59 = vmul.f32 %v2635_v33, %v2635_v33  ;;  %v823_v11 = vsel %vm270_vm0, %v2635_v33, 0.0 }
 0x18b   : > { %v2645_v41 = vpop.f32.mrb[3].mxu1  ;;  %v853_v42 = vsel %vm270_vm0, %v2643_v39, 0.0  ;;  %v957_v57 = vsel %vm270_vm0, %v919_v49, 0.0  ;;  %v927_v58 = vmul.f32 %v2643_v39, %v2643_v39  ;;  %v948_v19 = vsel %vm270_vm0, %v916_v12, 0.0 }
 0x18c   : > { %851 = vadd.xlane.f32.xlu0 %v850_v38  ;;  %v847_v48 = vsel %vm270_vm0, %v2645_v41, 0.0  ;;  %v978_v8 = vsel %vm270_vm0, %v926_v63, 0.0  ;;  %v951_v7 = vsel %vm270_vm0, %v917_v59, 0.0  ;;  %v925_v62 = vmul.f32 %v2645_v41, %v2645_v41 }
 0x18d   : > { %v981_v1 = vsel %vm270_vm0, %v927_v58, 0.0  ;;  %v924_v20 = vmul.f32 %v2639_v37, %v2639_v37  ;;  %v2020_v58 = vld [vmem:[#allocation7] sm:$0xff]  }
 0x18e   : > { %854 = vadd.xlane.f32.xlu1 %v853_v42  ;;  %v2649_v43 = vpop.f32.mrb[4].mxu0  ;;  %v975_v15 = vsel %vm270_vm0, %v925_v62, 0.0  ;;  %1881 = vmatprep.subr.bf16.mxu0 %v2020_v58 }
 0x18f   : > { %v2653_v46 = vpop.f32.mrb[5].mxu0  ;;  %v972_v22 = vsel %vm270_vm0, %v924_v20, 0.0  ;;  %v838_v24 = vsel %vm270_vm0, %v2649_v43, 0.0  ;;  %v922_v42 = vmul.f32 %v2649_v43, %v2649_v43  ;;  %1882 = vmatpush3.bf16.msra.mxu0 %v2020_v58  ;;  %1917 = vmatprep.subr.bf16.mxu1 %v2020_v58 }
 0x190   : > { %821 = vadd.xlane.f32.xlu0 %v820_v44  ;;  %v2655_v47 = vpop.f32.mrb[6].mxu0  ;;  %v2663_v51 = vpop.f32.mrb[4].mxu1  ;;  %v832_v27 = vsel %vm270_vm0, %v2653_v46, 0.0  ;;  %1919 = vmatpush3.bf16.msra.mxu1 %v2020_v58 }
 0x191   : > { %v2661_v50 = vpop.f32.mrb[7].mxu0  ;;  %v2665_v52 = vpop.f32.mrb[5].mxu1  ;;  %v841_v21 = vsel %vm270_vm0, %v2655_v47, 0.0  ;;  %v862_v45 = vsel %vm270_vm0, %v2663_v51, 0.0  ;;  %v923_v26 = vmul.f32 %v2655_v47, %v2655_v47 }
 0x192   : > { %848 = vadd.xlane.f32.xlu1 %v847_v48  ;;  %v2671_v55 = vpop.f32.mrb[6].mxu1  ;;  %v835_v40 = vsel %vm270_vm0, %v2661_v50, 0.0  ;;  %v921_v36 = vmul.f32 %v2661_v50, %v2661_v50  ;;  %v856_v38 = vsel %vm270_vm0, %v2665_v52, 0.0  ;;  %v966_v48 = vsel %vm270_vm0, %v922_v42, 0.0 }
 0x193   : > { %v2673_v56 = vpop.f32.mrb[7].mxu1  ;;  %v865_v23 = vsel %vm270_vm0, %v2671_v55, 0.0  ;;  %v969_v30 = vsel %vm270_vm0, %v923_v26, 0.0 }
 0x194   : > { %845 = vadd.xlane.f32.xlu0 %v844_v53  ;;  %v859_v25 = vsel %vm270_vm0, %v2673_v56, 0.0  ;;  %v963_v44 = vsel %vm270_vm0, %v921_v36, 0.0  ;;  %v920_v53 = vmul.f32 %v2653_v46, %v2653_v46 }
 0x196   : > { %958 = vadd.xlane.f32.xlu1 %v957_v57  ;;  %v2678_v60 = vpop.f32.mrb[8].mxu0  ;;  %v960_v54 = vsel %vm270_vm0, %v920_v53, 0.0 }
 0x197   : > { %v2683_v0 = vpop.f32.mrb[9].mxu0  ;;  %v934_v62 = vmul.f32 %v2678_v60, %v2678_v60 }
 0x198   : > { %955 = vadd.xlane.f32.xlu0 %v954_v61  ;;  %v2685_v3 = vpop.f32.mrb[10].mxu0  ;;  %v2692_v5 = vpop.f32.mrb[8].mxu1  ;;  %v868_v49 = vsel %vm270_vm0, %v2683_v0, 0.0  ;;  %v874_v61 = vsel %vm270_vm0, %v2678_v60, 0.0 }
 0x199   : > { %v2690_v4 = vpop.f32.mrb[11].mxu0  ;;  %v2694_v6 = vpop.f32.mrb[9].mxu1  ;;  %v877_v57 = vsel %vm270_vm0, %v2685_v3, 0.0  ;;  %v898_v59 = vsel %vm270_vm0, %v2692_v5, 0.0  ;;  %v935_v12 = vmul.f32 %v2685_v3, %v2685_v3 }
 0x19a   : > { %982 = vadd.xlane.f32.xlu1 %v981_v1  ;;  %v2697_v2 = vpop.f32.mrb[10].mxu1  ;;  %v2021_v1 = vld [vmem:[#allocation7 + $0x8] sm:$0xff]  }
 0x19b   : > { %v2699_v9 = vpop.f32.mrb[11].mxu1  ;;  %v901_v63 = vsel %vm270_vm0, %v2697_v2, 0.0  ;;  %1883 = vmatprep.subr.bf16.mxu0 %v2021_v1  ;;  %1918 = vmatprep.subr.bf16.mxu1 %v2021_v1  ;;  %v1005_v20 = vsel %vm270_vm0, %v935_v12, 0.0  ;;  %v929_v12 = vmul.f32 %v2673_v56, %v2673_v56 }
 0x19c   : > { %979 = vadd.xlane.f32.xlu0 %v978_v8  ;;  %v871_v8 = vsel %vm270_vm0, %v2690_v4, 0.0  ;;  %1884 = vmatpush3.bf16.msra.mxu0 %v2021_v1 }
 0x19d   : > { %1920 = vmatpush3.bf16.msra.mxu1 %v2021_v1 }
 0x19e   : > { %952 = vadd.xlane.f32.xlu1 %v951_v7  ;;  %v2704_v10 = vpop.f32.mrb[12].mxu0  ;;  %v892_v7 = vsel %vm270_vm0, %v2694_v6, 0.0 }
 0x19f   : > { %v2710_v13 = vpop.f32.mrb[13].mxu0  ;;  %v938_v53 = vmul.f32 %v2704_v10, %v2704_v10 }
 0x1a0   : > { %824 = vadd.xlane.f32.xlu0 %v823_v11  ;;  %v2712_v14 = vpop.f32.mrb[14].mxu0  ;;  %v2717_v17 = vpop.f32.mrb[12].mxu1  ;;  %v895_v11 = vsel %vm270_vm0, %v2699_v9, 0.0 }
 0x1a1   : > { %v2715_v16 = vpop.f32.mrb[15].mxu0  ;;  %v2719_v18 = vpop.f32.mrb[13].mxu1  ;;  %v889_v42 = vsel %vm270_vm0, %v2712_v14, 0.0  ;;  %v1014_v58 = vsel %vm270_vm0, %v938_v53, 0.0 }
 0x1a2   : > { %976 = vadd.xlane.f32.xlu1 %v975_v15  ;;  %v2724_v34 = vpop.f32.mrb[14].mxu1  ;;  %v1002_v15 = vsel %vm270_vm0, %v934_v62, 0.0  ;;  %v937_v1 = vmul.f32 %v2715_v16, %v2715_v16  ;;  %v928_v62 = vmul.f32 %v2665_v52, %v2665_v52 }
 0x1a3   : > { %v2726_v35 = vpop.f32.mrb[15].mxu1 }
 0x1a4   : > { %949 = vadd.xlane.f32.xlu0 %v948_v19  ;;  %v942_v19 = vmul.f32 %v2692_v5, %v2692_v5 }
 0x1a6   : > { %842 = vadd.xlane.f32.xlu1 %v841_v21  ;;  %v943_v21 = vmul.f32 %v2697_v2, %v2697_v2 }
 0x1a8   : > { %973 = vadd.xlane.f32.xlu0 %v972_v22  ;;  %v1026_v22 = vsel %vm270_vm0, %v942_v19, 0.0  ;;  %v944_v19 = vmul.f32 %v2719_v18, %v2719_v18 }
 0x1aa   : > { %866 = vadd.xlane.f32.xlu1 %v865_v23  ;;  %v932_v23 = vmul.f32 %v2683_v0, %v2683_v0 }
 0x1ac   : > { %839 = vadd.xlane.f32.xlu0 %v838_v24  ;;  %v1029_v24 = vsel %vm270_vm0, %v943_v21, 0.0  ;;  %v931_v21 = vmul.f32 %v2671_v55, %v2671_v55 }
 0x1ae   : > { %836 = vadd.xlane.f32.xlu1 %v835_v40  ;;  %v933_v40 = vmul.f32 %v2690_v4, %v2690_v4 }
 0x1b0   : > { %863 = vadd.xlane.f32.xlu0 %v862_v45  ;;  %v996_v45 = vsel %vm270_vm0, %v932_v23, 0.0  ;;  %v999_v26 = vsel %vm270_vm0, %v933_v40, 0.0  ;;  %v930_v23 = vmul.f32 %v2663_v51, %v2663_v51  ;;  %v945_v40 = vmul.f32 %v2726_v35, %v2726_v35 }
 0x1b2   : > { %860 = vadd.xlane.f32.xlu1 %v859_v25  ;;  %v940_v25 = vmul.f32 %v2694_v6, %v2694_v6 }
 0x1b4   : > { %833 = vadd.xlane.f32.xlu0 %v832_v27  ;;  %v941_v27 = vmul.f32 %v2699_v9, %v2699_v9 }
 0x1b6   : > { %970 = vadd.xlane.f32.xlu1 %v969_v30  ;;  %v1020_v30 = vsel %vm270_vm0, %v940_v25, 0.0  ;;  %v1023_v36 = vsel %vm270_vm0, %v941_v27, 0.0  ;;  %v946_v25 = vmul.f32 %v2717_v17, %v2717_v17  ;;  %v947_v27 = vmul.f32 %v2724_v34, %v2724_v34 }
 0x1b8   : > { %857 = vadd.xlane.f32.xlu0 %v856_v38  ;;  %v886_v38 = vsel %vm270_vm0, %v2704_v10, 0.0 }
 0x1ba   : > { %964 = vadd.xlane.f32.xlu1 %v963_v44  ;;  %v880_v44 = vsel %vm270_vm0, %v2710_v13, 0.0 }
 0x1bc   : > { %967 = vadd.xlane.f32.xlu0 %v966_v48  ;;  %v883_v48 = vsel %vm270_vm0, %v2715_v16, 0.0 }
 0x1be   : > { %869 = vadd.xlane.f32.xlu1 %v868_v49  ;;  %v904_v49 = vsel %vm270_vm0, %v2719_v18, 0.0 }
 0x1c0   : > { %961 = vadd.xlane.f32.xlu0 %v960_v54  ;;  %v907_v54 = vsel %vm270_vm0, %v2726_v35, 0.0 }
 0x1c2   : > { %878 = vadd.xlane.f32.xlu1 %v877_v57  ;;  %v939_v57 = vmul.f32 %v2712_v14, %v2712_v14 }
 0x1c4   : > { %875 = vadd.xlane.f32.xlu0 %v874_v61  ;;  %v936_v61 = vmul.f32 %v2710_v13, %v2710_v13 }
 0x1c6   : > { %902 = vadd.xlane.f32.xlu1 %v901_v63  ;;  %v1017_v63 = vsel %vm270_vm0, %v939_v57, 0.0 }
 0x1c8   : > { %899 = vadd.xlane.f32.xlu0 %v898_v59  ;;  %v1008_v59 = vsel %vm270_vm0, %v936_v61, 0.0 }
 0x1ca   : > { %872 = vadd.xlane.f32.xlu1 %v871_v8  ;;  %v1011_v8 = vsel %vm270_vm0, %v937_v1, 0.0 }
 0x1cc   : > { %893 = vadd.xlane.f32.xlu0 %v892_v7  ;;  %v910_v7 = vsel %vm270_vm0, %v2717_v17, 0.0 }
 0x1ce   : > { %896 = vadd.xlane.f32.xlu1 %v895_v11  ;;  %v913_v11 = vsel %vm270_vm0, %v2724_v34, 0.0 }
 0x1d0   : > { %1003 = vadd.xlane.f32.xlu0 %v1002_v15  ;;  %v984_v15 = vsel %vm270_vm0, %v928_v62, 0.0 }
 0x1d2   : > { %1006 = vadd.xlane.f32.xlu1 %v1005_v20  ;;  %v987_v20 = vsel %vm270_vm0, %v929_v12, 0.0 }
 0x1d4   : > { %1027 = vadd.xlane.f32.xlu0 %v1026_v22  ;;  %v1032_v22 = vsel %vm270_vm0, %v944_v19, 0.0 }
 0x1d6   : > { %1030 = vadd.xlane.f32.xlu1 %v1029_v24  ;;  %v993_v24 = vsel %vm270_vm0, %v931_v21, 0.0 }
 0x1d8   : > { %997 = vadd.xlane.f32.xlu0 %v996_v45  ;;  %v990_v45 = vsel %vm270_vm0, %v930_v23, 0.0 }
 0x1da   : > { %1000 = vadd.xlane.f32.xlu1 %v999_v26  ;;  %v1035_v26 = vsel %vm270_vm0, %v945_v40, 0.0 }
 0x1dc   : > { %1021 = vadd.xlane.f32.xlu0 %v1020_v30  ;;  %v1038_v30 = vsel %vm270_vm0, %v946_v25, 0.0 }
 0x1de   : > { %1024 = vadd.xlane.f32.xlu1 %v1023_v36  ;;  %v1041_v36 = vsel %vm270_vm0, %v947_v27, 0.0 }
 0x1e0   : > { %887 = vadd.xlane.f32.xlu0 %v886_v38 }
 0x1e2   : > { %890 = vadd.xlane.f32.xlu1 %v889_v42 }
 0x1e4   : > { %881 = vadd.xlane.f32.xlu0 %v880_v44 }
 0x1e6   : > { %884 = vadd.xlane.f32.xlu1 %v883_v48 }
 0x1e8   : > { %905 = vadd.xlane.f32.xlu0 %v904_v49 }
 0x1ea   : > { %908 = vadd.xlane.f32.xlu1 %v907_v54 }
 0x1ec   : > { %1015 = vadd.xlane.f32.xlu0 %v1014_v58 }
 0x1ee   : > { %1018 = vadd.xlane.f32.xlu1 %v1017_v63 }
 0x1f0   : > { %1009 = vadd.xlane.f32.xlu0 %v1008_v59 }
 0x1f2   : > { %1012 = vadd.xlane.f32.xlu1 %v1011_v8 }
 0x1f4   : > { %911 = vadd.xlane.f32.xlu0 %v910_v7 }
 0x1f6   : > { %914 = vadd.xlane.f32.xlu1 %v913_v11 }
 0x1f8   : > { %985 = vadd.xlane.f32.xlu0 %v984_v15 }
 0x1fa   : > { %988 = vadd.xlane.f32.xlu1 %v987_v20 }
 0x1fc   : > { %1033 = vadd.xlane.f32.xlu0 %v1032_v22 }
 0x1fe   : > { %994 = vadd.xlane.f32.xlu1 %v993_v24 }
 0x200   : > { %991 = vadd.xlane.f32.xlu0 %v990_v45 }
 0x202   : > { %1036 = vadd.xlane.f32.xlu1 %v1035_v26 }
 0x204   : > { %1039 = vadd.xlane.f32.xlu0 %v1038_v30 }
 0x206   : > { %1042 = vadd.xlane.f32.xlu1 %v1041_v36 }
 0x215   : > { %v828_v38 = vpop.xlane.xlu0 %827 }
 0x216   : > { %v2851_v58 = vmul.f32 0.03125, %v828_v38 }
 0x217   : > { %v831_v42 = vpop.xlane.xlu1 %830 }
 0x218   : > { %v2849_v54 = vmul.f32 0.03125, %v831_v42  ;;  %v1110_v62 = vmul.f32 %v2851_v58, %v2851_v58 }
 0x219   : > { %v852_v44 = vpop.xlane.xlu0 %851 }
 0x21a   : > { %v1111_v63 = vmul.f32 %v2849_v54, %v2849_v54  ;;  %v2857_v8 = vmul.f32 0.03125, %v852_v44 }
 0x21b   : > { %v855_v48 = vpop.xlane.xlu1 %854 }
 0x21c   : > { %v2855_v1 = vmul.f32 0.03125, %v855_v48  ;;  %v1118_v23 = vmul.f32 %v2857_v8, %v2857_v8 }
 0x21d   : > { %v822_v49 = vpop.xlane.xlu0 %821 }
 0x21e   : > { %v1119_v19 = vmul.f32 %v2855_v1, %v2855_v1  ;;  %v2865_v42 = vmul.f32 0.03125, %v822_v49 }
 0x21f   : > { %v849_v53 = vpop.xlane.xlu1 %848 }
 0x220   : > { %v2867_v44 = vmul.f32 0.03125, %v849_v53  ;;  %v1108_v53 = vmul.f32 %v2865_v42, %v2865_v42 }
 0x221   : > { %v846_v57 = vpop.xlane.xlu0 %845 }
 0x223   : > { %v959_v61 = vpop.xlane.xlu1 %958 }
 0x224   : > { %v1079_v59 = vmul.f32 0.03125, %v959_v61 }
 0x225   : > { %v956_v7 = vpop.xlane.xlu0 %955 }
 0x226   : > { %v1143_v11 = vsub.f32 %v1079_v59, %v1111_v63  ;;  %v1078_v12 = vmul.f32 0.03125, %v956_v7 }
 0x227   : > { %v983_v15 = vpop.xlane.xlu1 %982 }
 0x228   : > { %v1175_v20 = vmax.f32 %v1143_v11, 0.0  ;;  %v1142_v21 = vsub.f32 %v1078_v12, %v1110_v62  ;;  %v1087_v22 = vmul.f32 0.03125, %v983_v15  ;;  %v1117_v15 = vmul.f32 %v2867_v44, %v2867_v44 }
 0x229   : > { %v980_v24 = vpop.xlane.xlu0 %979 }
 0x22a   : > { %v1239_v40 = vadd.f32 1e-05, %v1175_v20  ;;  %v1174_v45 = vmax.f32 %v1142_v21, 0.0  ;;  %v1151_v25 = vsub.f32 %v1087_v22, %v1119_v19  ;;  %v1086_v26 = vmul.f32 0.03125, %v980_v24 }
 0x22b   : > { %v953_v27 = vpop.xlane.xlu1 %952  ;;  %v2877_v22 = vmul.f32 0.03125, %v846_v57 }
 0x22c   : > { %2030 = vrsqrt.f32 %v1239_v40  ;;  %v1238_v30 = vadd.f32 1e-05, %v1174_v45  ;;  %v1183_v36 = vmax.f32 %v1151_v25, 0.0  ;;  %v1150_v38 = vsub.f32 %v1086_v26, %v1118_v23 }
 0x22d   : > { %v825_v48 = vpop.xlane.xlu0 %824  ;;  %v1077_v11 = vmul.f32 0.03125, %v953_v27 }
 0x22e   : > { %2032 = vrsqrt.f32 %v1238_v30  ;;  %v1247_v61 = vadd.f32 1e-05, %v1183_v36  ;;  %v1182_v63 = vmax.f32 %v1150_v38, 0.0  ;;  %v2869_v59 = vmul.f32 0.03125, %v825_v48 }
 0x22f   : > { %v977_v7 = vpop.xlane.xlu1 %976  ;;  %v1206_v38 = vsub.f32 %v2625_v28, %v2851_v58  ;;  %v1207_v48 = vsub.f32 %v2631_v31, %v2849_v54  ;;  %v1214_v31 = vsub.f32 %v2633_v32, %v2857_v8  ;;  %v1215_v54 = vsub.f32 %v2643_v39, %v2855_v1 }
 0x230   : > { %2034 = vrsqrt.f32 %v1247_v61  ;;  %v1246_v62 = vadd.f32 1e-05, %v1182_v63  ;;  %v1109_v12 = vmul.f32 %v2869_v59, %v2869_v59  ;;  %v1085_v49 = vmul.f32 0.03125, %v977_v7 }
 0x231   : > { %v950_v19 = vpop.xlane.xlu0 %949  ;;  %v1116_v61 = vmul.f32 %v2877_v22, %v2877_v22 }
 0x232   : > { %2036 = vrsqrt.f32 %v1246_v62  ;;  %v1141_v20 = vsub.f32 %v1077_v11, %v1109_v12  ;;  %v1076_v21 = vmul.f32 0.03125, %v950_v19  ;;  %v1149_v23 = vsub.f32 %v1085_v49, %v1117_v15 }
 0x233   : > { %v843_v24 = vpop.xlane.xlu1 %842 }
 0x234   : > { %v1173_v40 = vmax.f32 %v1141_v20, 0.0  ;;  %v1140_v45 = vsub.f32 %v1076_v21, %v1108_v53  ;;  %v1181_v30 = vmax.f32 %v1149_v23, 0.0  ;;  %v2901_v8 = vmul.f32 0.03125, %v843_v24 }
 0x235   : > { %v974_v25 = vpop.xlane.xlu0 %973 }
 0x236   : > { %v2031_v26 = vpop.eup %2030  ;;  %v1237_v27 = vadd.f32 1e-05, %v1173_v40  ;;  %v1172_v36 = vmax.f32 %v1140_v45, 0.0  ;;  %v1084_v57 = vmul.f32 0.03125, %v974_v25  ;;  %v1245_v20 = vadd.f32 1e-05, %v1181_v30 }
 0x237   : > { %v867_v63 = vpop.xlane.xlu1 %866  ;;  %v1303_v12 = vmul.f32 %v2031_v26, %v1207_v48  ;;  %v1115_v24 = vmul.f32 %v2901_v8, %v2901_v8 }
 0x238   : > { %v2033_v7 = vpop.eup %2032  ;;  %2038 = vrsqrt.f32 %v1237_v27  ;;  %v1236_v62 = vadd.f32 1e-05, %v1172_v36  ;;  %v2885_v11 = vmul.f32 0.03125, %v867_v63  ;;  %v1148_v49 = vsub.f32 %v1084_v57, %v1116_v61 }
 0x239   : > { %v1302_v15 = vmul.f32 %v2033_v7, %v1206_v38  ;;  %v840_v19 = vpop.xlane.xlu0 %839  ;;  %v1204_v57 = vsub.f32 %v2627_v29, %v2865_v42  ;;  %v1205_v63 = vsub.f32 %v2635_v33, %v2869_v59  ;;  %v1212_v29 = vsub.f32 %v2639_v37, %v2877_v22 }
 0x23a   : > { %v2035_v53 = vpop.eup %2034  ;;  %2040 = vrsqrt.f32 %v1236_v62  ;;  %v1180_v21 = vmax.f32 %v1148_v49, 0.0 }
 0x23b   : > { %v1333_v58 = vpack.c.bf16 %v1303_v12, %v1302_v15  ;;  %v837_v23 = vpop.xlane.xlu1 %836  ;;  %v2895_v27 = vmul.f32 %v2035_v53, %v1215_v54  ;;  %2042 = vrsqrt.f32 %v1245_v20 }
 0x23c   : > { %v2037_v40 = vpop.eup %2036  ;;  %v1244_v45 = vadd.f32 1e-05, %v1180_v21  ;;  %v2915_v12 = vmul.f32 0.03125, %v837_v23 }
 0x23d   : > { %v864_v25 = vpop.xlane.xlu0 %863  ;;  %v2893_v26 = vmul.f32 %v2037_v40, %v1214_v31  ;;  %v1050_v31 = vmul.f32 0.03125, %v840_v19  ;;  %v1213_v19 = vsub.f32 %v2645_v41, %v2867_v44 }
 0x23e   : > { %v2897_v30 = vmul.f32 0.03125, %v864_v25  ;;  %2044 = vrsqrt.f32 %v1244_v45  ;;  %v1113_v40 = vmul.f32 %v2915_v12, %v2915_v12 }
 0x23f   : > { %v861_v36 = vpop.xlane.xlu1 %860  ;;  %v1337_v32 = vpack.c.bf16 %v2895_v27, %v2893_v26 }
 0x240   : > { %v2905_v1 = vmul.f32 0.03125, %v861_v36 }
 0x241   : > { %v834_v38 = vpop.xlane.xlu0 %833 }
 0x242   : > { %v2039_v48 = vpop.eup %2038 }
 0x243   : > { %v971_v7 = vpop.xlane.xlu1 %970  ;;  %v1301_v49 = vmul.f32 %v2039_v48, %v1205_v63 }
 0x244   : > { %v2041_v62 = vpop.eup %2040  ;;  %v1083_v15 = vmul.f32 0.03125, %v971_v7  ;;  %v1048_v7 = vmul.f32 0.03125, %v834_v38 }
 0x245   : > { %v858_v53 = vpop.xlane.xlu0 %857  ;;  %v1300_v20 = vmul.f32 %v2041_v62, %v1204_v57  ;;  %v2043_v59 = vpop.eup %2042  ;;  %v1114_v57 = vmul.f32 %v1050_v31, %v1050_v31 }
 0x246   : > { %v1147_v54 = vsub.f32 %v1083_v15, %v1115_v24  ;;  %v2917_v21 = vmul.f32 0.03125, %v858_v53  ;;  %v2931_v24 = vmul.f32 %v2043_v59, %v1213_v19 }
 0x247   : > { %v965_v42 = vpop.xlane.xlu1 %964  ;;  %v1332_v33 = vpack.c.bf16 %v1301_v49, %v1300_v20 }
 0x248   : > { %v1179_v45 = vmax.f32 %v1147_v54, 0.0  ;;  %v1216_v23 = vsub.f32 %v2665_v52, %v2917_v21  ;;  %v1081_v25 = vmul.f32 0.03125, %v965_v42  ;;  %v2045_v36 = vpop.eup %2044  ;;  %v1112_v54 = vmul.f32 %v1048_v7, %v1048_v7 }
 0x249   : > { %1885 = vmatprep.mubr.msk.bf16.mxu0 %vm270_vm0, %v1332_v33  ;;  %v968_v48 = vpop.xlane.xlu0 %967  ;;  %v2929_v63 = vmul.f32 %v2045_v36, %v1212_v29 }
 0x24a   : > { %v1145_v37 = vsub.f32 %v1081_v25, %v1113_v40  ;;  %v1082_v22 = vmul.f32 0.03125, %v968_v48  ;;  %1886 = vmatmul.mubr.msk.bf16.vlgmr.msra.gmra.mrb[16].mxu0 %vm270_vm0, %v1333_v58  ;;  %v1243_v15 = vadd.f32 1e-05, %v1179_v45 }
 0x24b   : > { %v870_v62 = vpop.xlane.xlu1 %869  ;;  %v1336_v41 = vpack.c.bf16 %v2931_v24, %v2929_v63 }
 0x24c   : > { %v1146_v49 = vsub.f32 %v1082_v22, %v1114_v57  ;;  %v1177_v44 = vmax.f32 %v1145_v37, 0.0  ;;  %2046 = vrsqrt.f32 %v1243_v15  ;;  %v1211_v22 = vsub.f32 %v2655_v47, %v2901_v8 }
 0x24d   : > { %v962_v53 = vpop.xlane.xlu0 %961  ;;  %v1210_v15 = vsub.f32 %v2649_v43, %v1050_v31  ;;  %v1208_v43 = vsub.f32 %v2653_v46, %v1048_v7 }
 0x24e   : > { %v1178_v20 = vmax.f32 %v1146_v49, 0.0  ;;  %v1080_v42 = vmul.f32 0.03125, %v962_v53  ;;  %v1241_v25 = vadd.f32 1e-05, %v1177_v44 }
 0x24f   : > { %v879_v33 = vpop.xlane.xlu1 %878 }
 0x250   : > { %v1242_v40 = vadd.f32 1e-05, %v1178_v20  ;;  %v1144_v58 = vsub.f32 %v1080_v42, %v1112_v54  ;;  %v2940_v44 = vmul.f32 0.03125, %v879_v33 }
 0x251   : > { %v876_v29 = vpop.xlane.xlu0 %875 }
 0x252   : > { %2048 = vrsqrt.f32 %v1242_v40  ;;  %v1176_v38 = vmax.f32 %v1144_v58, 0.0  ;;  %v2935_v37 = vmul.f32 0.03125, %v876_v29  ;;  %v1127_v8 = vmul.f32 %v2940_v44, %v2940_v44 }
 0x253   : > { %v903_v59 = vpop.xlane.xlu1 %902  ;;  %2050 = vrsqrt.f32 %v1241_v25 }
 0x254   : > { %v1240_v36 = vadd.f32 1e-05, %v1176_v38  ;;  %v1126_v58 = vmul.f32 %v2935_v37, %v2935_v37  ;;  %v2946_v29 = vmul.f32 0.03125, %v903_v59 }
 0x255   : > { %v900_v45 = vpop.xlane.xlu0 %899 }
 0x256   : > { %2052 = vrsqrt.f32 %v1240_v36  ;;  %v2047_v57 = vpop.eup %2046  ;;  %v2942_v20 = vmul.f32 0.03125, %v900_v45  ;;  %v1135_v46 = vmul.f32 %v2946_v29, %v2946_v29  ;;  %v1231_v26 = vsub.f32 %v2697_v2, %v2946_v29 }
 0x257   : > { %v873_v19 = vpop.xlane.xlu1 %872  ;;  %v1307_v40 = vmul.f32 %v2047_v57, %v1211_v22  ;;  %v1209_v57 = vsub.f32 %v2661_v50, %v2915_v12 }
 0x258   : > { %v1134_v22 = vmul.f32 %v2942_v20, %v2942_v20  ;;  %v2959_v7 = vmul.f32 0.03125, %v873_v19  ;;  %v1230_v27 = vsub.f32 %v2692_v5, %v2942_v20 }
 0x259   : > { %v894_v48 = vpop.xlane.xlu0 %893 }
 0x25a   : > { %v2961_v28 = vmul.f32 0.03125, %v894_v48  ;;  %v1125_v19 = vmul.f32 %v2959_v7, %v2959_v7  ;;  %v1221_v5 = vsub.f32 %v2690_v4, %v2959_v7 }
 0x25b   : > { %v897_v49 = vpop.xlane.xlu1 %896 }
 0x25c   : > { %v2049_v53 = vpop.eup %2048 }
 0x25d   : > { %v1004_v54 = vpop.xlane.xlu0 %1003  ;;  %v1306_v42 = vmul.f32 %v2049_v53, %v1210_v15  ;;  %v2051_v47 = vpop.eup %2050 }
 0x25e   : > { %v1094_v25 = vmul.f32 0.03125, %v1004_v54 }
 0x25f   : > { %v1007_v38 = vpop.xlane.xlu1 %1006  ;;  %v1335_v36 = vpack.c.bf16 %v1307_v40, %v1306_v42  ;;  %v2955_v40 = vmul.f32 0.03125, %v870_v62 }
 0x260   : > { %v1158_v31 = vsub.f32 %v1094_v25, %v1126_v58  ;;  %v1095_v33 = vmul.f32 0.03125, %v1007_v38  ;;  %v2053_v45 = vpop.eup %2052  ;;  %v1305_v25 = vmul.f32 %v2051_v47, %v1209_v57 }
 0x261   : > { %v1028_v15 = vpop.xlane.xlu0 %1027  ;;  %v1304_v42 = vmul.f32 %v2053_v45, %v1208_v43  ;;  %v2967_v45 = vmul.f32 0.03125, %v897_v49  ;;  %v1220_v2 = vsub.f32 %v2683_v0, %v2955_v40 }
 0x262   : > { %v1190_v59 = vmax.f32 %v1158_v31, 0.0  ;;  %v1159_v53 = vsub.f32 %v1095_v33, %v1127_v8  ;;  %v1102_v54 = vmul.f32 0.03125, %v1028_v15  ;;  %v1124_v33 = vmul.f32 %v2955_v40, %v2955_v40 }
 0x263   : > { %v1031_v58 = vpop.xlane.xlu1 %1030  ;;  %v1334_v61 = vpack.c.bf16 %v1305_v25, %v1304_v42  ;;  %v1132_v15 = vmul.f32 %v2961_v28, %v2961_v28  ;;  %v1133_v42 = vmul.f32 %v2967_v45, %v2967_v45 }
 0x264   : > { %v1254_v38 = vadd.f32 1e-05, %v1190_v59  ;;  %v1191_v39 = vmax.f32 %v1159_v53, 0.0  ;;  %v1166_v50 = vsub.f32 %v1102_v54, %v1134_v22  ;;  %v1103_v12 = vmul.f32 0.03125, %v1031_v58 }
 0x265   : > { %v998_v31 = vpop.xlane.xlu0 %997  ;;  %1889 = vmatprep.mubr.msk.bf16.mxu0 %vm270_vm0, %v1334_v61 }
 0x266   : > { %2054 = vrsqrt.f32 %v1254_v38  ;;  %v1255_v8 = vadd.f32 1e-05, %v1191_v39  ;;  %v1198_v43 = vmax.f32 %v1166_v50, 0.0  ;;  %v1167_v62 = vsub.f32 %v1103_v12, %v1135_v46  ;;  %1890 = vmatmul.mubr.msk.bf16.gmra.mrb[20].mxu0 %vm270_vm0, %v1335_v36 }
 0x267   : > { %v1092_v47 = vmul.f32 0.03125, %v998_v31  ;;  %v1001_v57 = vpop.xlane.xlu1 %1000  ;;  %1893 = vmatprep.mubr.msk.bf16.mxu0 %vm270_vm0, %v1336_v41 }
 0x268   : > { %2056 = vrsqrt.f32 %v1255_v8  ;;  %v1262_v48 = vadd.f32 1e-05, %v1198_v43  ;;  %v1199_v22 = vmax.f32 %v1167_v62, 0.0  ;;  %v1093_v39 = vmul.f32 0.03125, %v1001_v57 }
 0x269   : > { %v1156_v59 = vsub.f32 %v1092_v47, %v1124_v33  ;;  %v1022_v49 = vpop.xlane.xlu0 %1021  ;;  %v1223_v33 = vsub.f32 %v2685_v3, %v2940_v44 }
 0x26a   : > { %2058 = vrsqrt.f32 %v1262_v48  ;;  %v1263_v61 = vadd.f32 1e-05, %v1199_v22  ;;  %v1157_v53 = vsub.f32 %v1093_v39, %v1125_v19  ;;  %v1100_v54 = vmul.f32 0.03125, %v1022_v49 }
 0x26b   : > { %v1188_v46 = vmax.f32 %v1156_v59, 0.0  ;;  %v1025_v36 = vpop.xlane.xlu1 %1024  ;;  %v1222_v19 = vsub.f32 %v2678_v60, %v2935_v37 }
 0x26c   : > { %2060 = vrsqrt.f32 %v1263_v61  ;;  %v1189_v58 = vmax.f32 %v1157_v53, 0.0  ;;  %v1164_v25 = vsub.f32 %v1100_v54, %v1132_v15  ;;  %v1101_v38 = vmul.f32 0.03125, %v1025_v36 }
 0x26d   : > { %v1252_v50 = vadd.f32 1e-05, %v1188_v46  ;;  %v888_v12 = vpop.xlane.xlu0 %887 }
 0x26e   : > { %v1253_v31 = vadd.f32 1e-05, %v1189_v58  ;;  %v1196_v63 = vmax.f32 %v1164_v25, 0.0  ;;  %v1165_v24 = vsub.f32 %v1101_v38, %v1133_v42  ;;  %1894 = vmatmul.mubr.msk.bf16.gmra.mrb[24].mxu0 %vm270_vm0, %v1337_v32  ;;  %v2991_v49 = vmul.f32 0.03125, %v888_v12 }
 0x26f   : > { %2062 = vrsqrt.f32 %v1252_v50  ;;  %v891_v41 = vpop.xlane.xlu1 %890 }
 0x270   : > { %v2055_v8 = vpop.eup %2054  ;;  %2064 = vrsqrt.f32 %v1253_v31  ;;  %v1260_v43 = vadd.f32 1e-05, %v1196_v63  ;;  %v1197_v62 = vmax.f32 %v1165_v24, 0.0  ;;  %v2999_v53 = vmul.f32 0.03125, %v891_v41 }
 0x271   : > { %v882_v47 = vpop.xlane.xlu0 %881  ;;  %v1318_v22 = vmul.f32 %v2055_v8, %v1222_v19  ;;  %v1130_v46 = vmul.f32 %v2991_v49, %v2991_v49  ;;  %v1228_v31 = vsub.f32 %v2694_v6, %v2961_v28  ;;  %v1229_v63 = vsub.f32 %v2699_v9, %v2967_v45 }
 0x272   : > { %v2057_v57 = vpop.eup %2056  ;;  %2066 = vrsqrt.f32 %v1260_v43  ;;  %v1261_v48 = vadd.f32 1e-05, %v1197_v62  ;;  %v3009_v36 = vmul.f32 0.03125, %v882_v47  ;;  %v1131_v4 = vmul.f32 %v2999_v53, %v2999_v53 }
 0x273   : > { %v1319_v39 = vmul.f32 %v2057_v57, %v1223_v33  ;;  %v885_v15 = vpop.xlane.xlu1 %884 }
 0x274   : > { %v2059_v59 = vpop.eup %2058  ;;  %2068 = vrsqrt.f32 %v1261_v48  ;;  %v3011_v25 = vmul.f32 0.03125, %v885_v15  ;;  %v1128_v43 = vmul.f32 %v3009_v36, %v3009_v36 }
 0x275   : > { %v1341_v32 = vpack.c.bf16 %v1319_v39, %v1318_v22  ;;  %v906_v3 = vpop.xlane.xlu0 %905  ;;  %v2995_v37 = vmul.f32 %v2059_v59, %v1230_v27 }
 0x276   : > { %v2061_v44 = vpop.eup %2060  ;;  %v1129_v47 = vmul.f32 %v3011_v25, %v3011_v25 }
 0x277   : > { %v2993_v60 = vpop.xlane.xlu1 %908  ;;  %v2997_v61 = vmul.f32 %v2061_v44, %v1231_v26 }
 0x279   : > { %v2063_v54 = vpop.eup %2062  ;;  %v1016_v20 = vpop.xlane.xlu0 %1015  ;;  %v1345_v29 = vpack.c.bf16 %v2997_v61, %v2995_v37 }
 0x27a   : > { %v2065_v42 = vpop.eup %2064  ;;  %v1098_v58 = vmul.f32 0.03125, %v1016_v20  ;;  %v1316_v50 = vmul.f32 %v2063_v54, %v1220_v2  ;;  %v3031_v20 = vmul.f32 0.03125, %v906_v3 }
 0x27b   : > { %v1019_v38 = vpop.xlane.xlu1 %1018  ;;  %v1317_v12 = vmul.f32 %v2065_v42, %v1221_v5 }
 0x27c   : > { %v2067_v0 = vpop.eup %2066  ;;  %v1162_v40 = vsub.f32 %v1098_v58, %v1130_v46  ;;  %v1099_v7 = vmul.f32 0.03125, %v1019_v38  ;;  %v1121_v38 = vmul.f32 %v2905_v1, %v2905_v1 }
 0x27d   : > { %v1010_v24 = vpop.xlane.xlu0 %1009  ;;  %v1340_v41 = vpack.c.bf16 %v1317_v12, %v1316_v50  ;;  %v3024_v48 = vmul.f32 %v2067_v0, %v1228_v31  ;;  %v1122_v31 = vmul.f32 %v2897_v30, %v2897_v30 }
 0x27e   : > { %v2069_v8 = vpop.eup %2068  ;;  %v1194_v62 = vmax.f32 %v1162_v40, 0.0  ;;  %v1163_v33 = vsub.f32 %v1099_v7, %v1131_v4  ;;  %v1096_v19 = vmul.f32 0.03125, %v1010_v24  ;;  %v1136_v4 = vmul.f32 %v3031_v20, %v3031_v20 }
 0x27f   : > { %1901 = vmatprep.mubr.msk.bf16.mxu1 %vm270_vm0, %v1340_v41  ;;  %v1013_v57 = vpop.xlane.xlu1 %1012  ;;  %v3026_v6 = vmul.f32 %v2069_v8, %v1229_v63  ;;  %v1123_v7 = vmul.f32 %v2885_v11, %v2885_v11  ;;  %v1226_v63 = vsub.f32 %v2704_v10, %v2991_v49 }
 0x280   : > { %v1258_v9 = vadd.f32 1e-05, %v1194_v62  ;;  %v1195_v28 = vmax.f32 %v1163_v33, 0.0  ;;  %v1160_v45 = vsub.f32 %v1096_v19, %v1128_v43  ;;  %v1097_v22 = vmul.f32 0.03125, %v1013_v57  ;;  %1902 = vmatmul.mubr.msk.bf16.vlgmr.msra.gmra.mrb[16].mxu1 %vm270_vm0, %v1341_v32 }
 0x281   : > { %v912_v39 = vpop.xlane.xlu0 %911  ;;  %v1344_v15 = vpack.c.bf16 %v3026_v6, %v3024_v48  ;;  %v1120_v32 = vmul.f32 %v2917_v21, %v2917_v21  ;;  %v1227_v43 = vsub.f32 %v2712_v14, %v2999_v53  ;;  %v3050_v57 = vmul.f32 0.03125, %v2993_v60 }
 0x282   : > { %2070 = vrsqrt.f32 %v1258_v9  ;;  %v1259_v59 = vadd.f32 1e-05, %v1195_v28  ;;  %v1192_v26 = vmax.f32 %v1160_v45, 0.0  ;;  %v1161_v27 = vsub.f32 %v1097_v22, %v1129_v47 }
 0x283   : > { %v915_v44 = vpop.xlane.xlu1 %914  ;;  %v1224_v47 = vsub.f32 %v2710_v13, %v3009_v36  ;;  %v3052_v9 = vmul.f32 0.03125, %v912_v39  ;;  %v1225_v13 = vsub.f32 %v2715_v16, %v3011_v25  ;;  %v1137_v39 = vmul.f32 %v3050_v57, %v3050_v57 }
 0x284   : > { %2072 = vrsqrt.f32 %v1259_v59  ;;  %v1256_v54 = vadd.f32 1e-05, %v1192_v26  ;;  %v1193_v2 = vmax.f32 %v1161_v27, 0.0  ;;  %v3054_v49 = vmul.f32 0.03125, %v915_v44 }
 0x285   : > { %v986_v5 = vpop.xlane.xlu0 %985  ;;  %v1138_v44 = vmul.f32 %v3052_v9, %v3052_v9  ;;  %v3241_v48 = vsub.f32 %v2671_v55, %v2885_v11  ;;  %v1232_v21 = vsub.f32 %v2719_v18, %v3031_v20  ;;  %v1234_v37 = vsub.f32 %v2717_v17, %v3052_v9  ;;  %v3099_v20 = vld [vmem:[#allocation8] ss:$0 sm:$0xff] }
 0x286   : > { %2074 = vrsqrt.f32 %v1256_v54  ;;  %v1257_v42 = vadd.f32 1e-05, %v1193_v2  ;;  %v1088_v46 = vmul.f32 0.03125, %v986_v5  ;;  %v1235_v61 = vsub.f32 %v2724_v34, %v3054_v49 }
 0x287   : > { %v989_v58 = vpop.xlane.xlu1 %988 }
 0x288   : > { %2076 = vrsqrt.f32 %v1257_v42  ;;  %v1089_v50 = vmul.f32 0.03125, %v989_v58  ;;  %v1152_v12 = vsub.f32 %v1088_v46, %v1120_v32  ;;  %v1139_v58 = vmul.f32 %v3054_v49, %v3054_v49 }
 0x289   : > { %v1034_v0 = vpop.xlane.xlu0 %1033 }
 0x28a   : > { %v1153_v40 = vsub.f32 %v1089_v50, %v1121_v38  ;;  %v1104_v3 = vmul.f32 0.03125, %v1034_v0  ;;  %v1184_v24 = vmax.f32 %v1152_v12, 0.0 }
 0x28b   : > { %v995_v41 = vpop.xlane.xlu1 %994 }
 0x28c   : > { %v2071_v8 = vpop.eup %2070  ;;  %v1185_v62 = vmax.f32 %v1153_v40, 0.0  ;;  %v1168_v33 = vsub.f32 %v1104_v3, %v1136_v4  ;;  %v1091_v19 = vmul.f32 0.03125, %v995_v41  ;;  %v1248_v28 = vadd.f32 1e-05, %v1184_v24 }
 0x28d   : > { %v992_v45 = vpop.xlane.xlu0 %991  ;;  %v1322_v27 = vmul.f32 %v2071_v8, %v1226_v63 }
 0x28e   : > { %v2073_v10 = vpop.eup %2072  ;;  %v1249_v22 = vadd.f32 1e-05, %v1185_v62  ;;  %v1155_v59 = vsub.f32 %v1091_v19, %v1123_v7  ;;  %v1090_v26 = vmul.f32 0.03125, %v992_v45  ;;  %2078 = vrsqrt.f32 %v1248_v28 }
 0x28f   : > { %v1200_v14 = vmax.f32 %v1168_v33, 0.0  ;;  %v1037_v53 = vpop.xlane.xlu1 %1036  ;;  %v1323_v54 = vmul.f32 %v2073_v10, %v1227_v43  ;;  %v3240_v10 = vsub.f32 %v2673_v56, %v2905_v1  ;;  %v3242_v56 = vsub.f32 %v2663_v51, %v2897_v30 }
 0x290   : > { %v2075_v2 = vpop.eup %2074  ;;  %2080 = vrsqrt.f32 %v1249_v22  ;;  %v1187_v60 = vmax.f32 %v1155_v59, 0.0  ;;  %v1154_v36 = vsub.f32 %v1090_v26, %v1122_v31  ;;  %v1105_v5 = vmul.f32 0.03125, %v1037_v53 }
 0x291   : > { %v1040_v42 = vpop.xlane.xlu0 %1039  ;;  %v1343_v32 = vpack.c.bf16 %v1323_v54, %v1322_v27  ;;  %v1264_v16 = vadd.f32 1e-05, %v1200_v14  ;;  %v1320_v4 = vmul.f32 %v2075_v2, %v1224_v47 }
 0x292   : > { %v2077_v46 = vpop.eup %2076  ;;  %v1251_v38 = vadd.f32 1e-05, %v1187_v60  ;;  %v1186_v50 = vmax.f32 %v1154_v36, 0.0  ;;  %v1106_v12 = vmul.f32 0.03125, %v1040_v42  ;;  %v1169_v25 = vsub.f32 %v1105_v5, %v1137_v39 }
 0x293   : > { %v1043_v0 = vpop.xlane.xlu1 %1042  ;;  %v1321_v40 = vmul.f32 %v2077_v46, %v1225_v13 }
 0x294   : > { %2082 = vrsqrt.f32 %v1251_v38  ;;  %v1250_v3 = vadd.f32 1e-05, %v1186_v50  ;;  %v1170_v7 = vsub.f32 %v1106_v12, %v1138_v44  ;;  %v1107_v31 = vmul.f32 0.03125, %v1043_v0 }
 0x295   : > { %v1201_v63 = vmax.f32 %v1169_v25, 0.0  ;;  %v1342_v24 = vpack.c.bf16 %v1321_v40, %v1320_v4 }
 0x296   : > { %2084 = vrsqrt.f32 %v1250_v3  ;;  %v1202_v41 = vmax.f32 %v1170_v7, 0.0  ;;  %v1171_v8 = vsub.f32 %v1107_v31, %v1139_v58 }
 0x297   : > { %2086 = vrsqrt.f32 %v1264_v16  ;;  %v1265_v43 = vadd.f32 1e-05, %v1201_v63  ;;  %1905 = vmatprep.mubr.msk.bf16.mxu1 %vm270_vm0, %v1342_v24 }
 0x298   : > { %v1266_v62 = vadd.f32 1e-05, %v1202_v41  ;;  %v1203_v33 = vmax.f32 %v1171_v8, 0.0  ;;  %1906 = vmatmul.mubr.msk.bf16.gmra.mrb[20].mxu1 %vm270_vm0, %v1343_v32  ;;  %v2079_v19 = vpop.eup %2078 }
 0x299   : > { %2088 = vrsqrt.f32 %v1265_v43  ;;  %1909 = vmatprep.mubr.msk.bf16.mxu1 %vm270_vm0, %v1344_v15  ;;  %v1312_v45 = vmul.f32 %v2079_v19, %v1216_v23  ;;  %v1233_v23 = vsub.f32 %v2726_v35, %v3050_v57 }
 0x29a   : > { %v2081_v47 = vpop.eup %2080  ;;  %2090 = vrsqrt.f32 %v1266_v62  ;;  %v1267_v28 = vadd.f32 1e-05, %v1203_v33 }
 0x29b   : > { %v1313_v22 = vmul.f32 %v2081_v47, %v3240_v10 }
 0x29c   : > { %2092 = vrsqrt.f32 %v1267_v28 }
 0x29d   : > { %v1338_v59 = vpack.c.bf16 %v1313_v22, %v1312_v45 }
 0x29e   : > { %v2083_v26 = vpop.eup %2082 }
 0x29f   : > { %1897 = vmatprep.mubr.msk.bf16.mxu0 %vm270_vm0, %v1338_v59  ;;  %v1315_v6 = vmul.f32 %v2083_v26, %v3241_v48 }
 0x2a0   : > { %v2085_v15 = vpop.eup %2084  ;;  %1910 = vmatmul.mubr.msk.bf16.gmra.mrb[24].mxu1 %vm270_vm0, %v1345_v29 }
 0x2a1   : > { %v2087_v52 = vpop.eup %2086  ;;  %v1314_v1 = vmul.f32 %v2085_v15, %v3242_v56 }
 0x2a2   : > { %v1328_v53 = vmul.f32 %v2087_v52, %v1232_v21 }
 0x2a3   : > { %v2089_v55 = vpop.eup %2088  ;;  %v1339_v11 = vpack.c.bf16 %v1315_v6, %v1314_v1 }
 0x2a4   : > { %v2091_v14 = vpop.eup %2090  ;;  %v1329_v27 = vmul.f32 %v2089_v55, %v1233_v23 }
 0x2a5   : > { %1898 = vmatmul.mubr.msk.bf16.gmra.mrb[28].mxu0 %vm270_vm0, %v1339_v11  ;;  %v1330_v18 = vmul.f32 %v2091_v14, %v1234_v37 }
 0x2a6   : > { %v2093_v51 = vpop.eup %2092  ;;  %v1346_v30 = vpack.c.bf16 %v1329_v27, %v1328_v53 }
 0x2a7   : > { %v1331_v29 = vmul.f32 %v2093_v51, %v1235_v61 }
 0x2a8   : > { %1913 = vmatprep.mubr.msk.bf16.mxu1 %vm270_vm0, %v1346_v30 }
 0x2a9   : > { %v1347_v35 = vpack.c.bf16 %v1331_v29, %v1330_v18 }
 0x2ab   : > { %1914 = vmatmul.mubr.msk.bf16.gmra.mrb[28].mxu1 %vm270_vm0, %v1347_v35 }
 0x31d   : > { %v1887_v57 = vpop.f32.mrb[16].mxu0 }
 0x31e   : > { %v1462_v17 = vadd.f32 %v1887_v57, %v3099_v20  ;;  %v1453_v9 = vpop.f32.mrb[17].mxu0 }
 0x31f   : > { %v1454_v34 = vadd.f32 %v3099_v20, %v1453_v9  ;;  %v1888_v49 = vpop.f32.mrb[18].mxu0 }
 0x320   : > { %1582 = vst [vmem:[%s3103_s23 + $0x10] sm:$0xff] %v1462_v17  ;;  %v1465_v54 = vadd.f32 %v1888_v49, %v3099_v20  ;;  %v1456_v2 = vpop.f32.mrb[19].mxu0 }
 0x321   : > { %1580 = vst [vmem:[%s3103_s23] sm:$0xff] %v1454_v34  ;;  %v1457_v13 = vadd.f32 %v3099_v20, %v1456_v2 }
 0x322   : > { %1583 = vst [vmem:[%s3103_s23 + $0x18] sm:$0xff] %v1465_v54 }
 0x323   : > { %1581 = vst [vmem:[%s3103_s23 + $0x8] sm:$0xff] %v1457_v13 }
 0x339   : > { %v1891_v60 = vpop.f32.mrb[20].mxu0 }
 0x33a   : > { %v1478_v36 = vadd.f32 %v1891_v60, %v3099_v20  ;;  %v1469_v39 = vpop.f32.mrb[21].mxu0 }
 0x33b   : > { %v1470_v44 = vadd.f32 %v3099_v20, %v1469_v39  ;;  %v1892_v5 = vpop.f32.mrb[22].mxu0 }
 0x33c   : > { %1586 = vst [vmem:[%s3103_s23 + $0x30] sm:$0xff] %v1478_v36  ;;  %v1481_v42 = vadd.f32 %v1892_v5, %v3099_v20  ;;  %v1472_v32 = vpop.f32.mrb[23].mxu0 }
 0x33d   : > { %1584 = vst [vmem:[%s3103_s23 + $0x20] sm:$0xff] %v1470_v44  ;;  %v1473_v46 = vadd.f32 %v3099_v20, %v1472_v32 }
 0x33e   : > { %1587 = vst [vmem:[%s3103_s23 + $0x38] sm:$0xff] %v1481_v42 }
 0x33f   : > { %1585 = vst [vmem:[%s3103_s23 + $0x28] sm:$0xff] %v1473_v46 }
 0x341   : > { %v1895_v58 = vpop.f32.mrb[24].mxu0 }
 0x342   : > { %v1494_v38 = vadd.f32 %v1895_v58, %v3099_v20  ;;  %v1485_v50 = vpop.f32.mrb[25].mxu0 }
 0x343   : > { %v1486_v12 = vadd.f32 %v3099_v20, %v1485_v50  ;;  %v1896_v16 = vpop.f32.mrb[26].mxu0 }
 0x344   : > { %1590 = vst [vmem:[%s3103_s23 + $0x50] sm:$0xff] %v1494_v38  ;;  %v1497_v25 = vadd.f32 %v1896_v16, %v3099_v20  ;;  %v1488_v0 = vpop.f32.mrb[27].mxu0 }
 0x345   : > { %1588 = vst [vmem:[%s3103_s23 + $0x40] sm:$0xff] %v1486_v12  ;;  %v1489_v4 = vadd.f32 %v3099_v20, %v1488_v0 }
 0x346   : > { %1591 = vst [vmem:[%s3103_s23 + $0x58] sm:$0xff] %v1497_v25 }
 0x347   : > { %1589 = vst [vmem:[%s3103_s23 + $0x48] sm:$0xff] %v1489_v4 }
 0x353   : > { %v1903_v40 = vpop.f32.mrb[16].mxu1 }
 0x354   : > { %v1526_v3 = vadd.f32 %v1903_v40, %v3099_v20  ;;  %v1517_v7 = vpop.f32.mrb[17].mxu1 }
 0x355   : > { %v1518_v31 = vadd.f32 %v3099_v20, %v1517_v7  ;;  %v1904_v63 = vpop.f32.mrb[18].mxu1 }
 0x356   : > { %1598 = vst [vmem:[%s3103_s23 + $0x90] sm:$0xff] %v1526_v3  ;;  %v1529_v24 = vadd.f32 %v1904_v63, %v3099_v20  ;;  %v1520_v41 = vpop.f32.mrb[19].mxu1 }
 0x357   : > { %1596 = vst [vmem:[%s3103_s23 + $0x80] sm:$0xff] %v1518_v31  ;;  %v1521_v8 = vadd.f32 %v3099_v20, %v1520_v41 }
 0x358   : > { %1599 = vst [vmem:[%s3103_s23 + $0x98] sm:$0xff] %v1529_v24 }
 0x359   : > { %1597 = vst [vmem:[%s3103_s23 + $0x88] sm:$0xff] %v1521_v8 }
 0x36b   : > { %v1907_v43 = vpop.f32.mrb[20].mxu1 }
 0x36c   : > { %v1542_v62 = vadd.f32 %v1907_v43, %v3099_v20  ;;  %v1533_v33 = vpop.f32.mrb[21].mxu1 }
 0x36d   : > { %v1534_v19 = vadd.f32 %v3099_v20, %v1533_v33  ;;  %v1908_v47 = vpop.f32.mrb[22].mxu1 }
 0x36e   : > { %1602 = vst [vmem:[%s3103_s23 + $0xb0] sm:$0xff] %v1542_v62  ;;  %v1545_v28 = vadd.f32 %v1908_v47, %v3099_v20  ;;  %v1536_v45 = vpop.f32.mrb[23].mxu1 }
 0x36f   : > { %1600 = vst [vmem:[%s3103_s23 + $0xa0] sm:$0xff] %v1534_v19  ;;  %v1537_v10 = vadd.f32 %v3099_v20, %v1536_v45 }
 0x370   : > { %1603 = vst [vmem:[%s3103_s23 + $0xb8] sm:$0xff] %v1545_v28 }
 0x371   : > { %1601 = vst [vmem:[%s3103_s23 + $0xa8] sm:$0xff] %v1537_v10 }
 0x373   : > { %v1911_v22 = vpop.f32.mrb[24].mxu1 }
 0x374   : > { %v1558_v59 = vadd.f32 %v1911_v22, %v3099_v20  ;;  %v1549_v26 = vpop.f32.mrb[25].mxu1 }
 0x375   : > { %v1550_v48 = vadd.f32 %v3099_v20, %v1549_v26  ;;  %v1912_v6 = vpop.f32.mrb[26].mxu1 }
 0x376   : > { %1606 = vst [vmem:[%s3103_s23 + $0xd0] sm:$0xff] %v1558_v59  ;;  %v1561_v15 = vadd.f32 %v1912_v6, %v3099_v20  ;;  %v1552_v52 = vpop.f32.mrb[27].mxu1 }
 0x377   : > { %1604 = vst [vmem:[%s3103_s23 + $0xc0] sm:$0xff] %v1550_v48  ;;  %v1553_v56 = vadd.f32 %v3099_v20, %v1552_v52 }
 0x378   : > { %1607 = vst [vmem:[%s3103_s23 + $0xd8] sm:$0xff] %v1561_v15  ;;  %v1899_v1 = vpop.f32.mrb[28].mxu0 }
 0x379   : > { %1605 = vst [vmem:[%s3103_s23 + $0xc8] sm:$0xff] %v1553_v56  ;;  %v1510_v21 = vadd.f32 %v1899_v1, %v3099_v20  ;;  %v1501_v23 = vpop.f32.mrb[29].mxu0 }
 0x37a   : > { %v1502_v55 = vadd.f32 %v3099_v20, %v1501_v23  ;;  %v1900_v11 = vpop.f32.mrb[30].mxu0 }
 0x37b   : > { %1594 = vst [vmem:[%s3103_s23 + $0x70] sm:$0xff] %v1510_v21  ;;  %v1513_v14 = vadd.f32 %v1900_v11, %v3099_v20  ;;  %v1504_v53 = vpop.f32.mrb[31].mxu0 }
 0x37c   : > { %1592 = vst [vmem:[%s3103_s23 + $0x60] sm:$0xff] %v1502_v55  ;;  %v1505_v27 = vadd.f32 %v3099_v20, %v1504_v53 }
 0x37d   : > { %1595 = vst [vmem:[%s3103_s23 + $0x78] sm:$0xff] %v1513_v14 }
 0x37e   : > { %1593 = vst [vmem:[%s3103_s23 + $0x68] sm:$0xff] %v1505_v27  ;;  %v1915_v37 = vpop.f32.mrb[28].mxu1 }
 0x37f   : > { %v1574_v61 = vadd.f32 %v1915_v37, %v3099_v20  ;;  %v1565_v51 = vpop.f32.mrb[29].mxu1 }
 0x380   : > { %v1566_v30 = vadd.f32 %v3099_v20, %v1565_v51  ;;  %v1916_v18 = vpop.f32.mrb[30].mxu1 }
 0x381   : > { %1610 = vst [vmem:[%s3103_s23 + $0xf0] sm:$0xff] %v1574_v61  ;;  %v1577_v29 = vadd.f32 %v1916_v18, %v3099_v20  ;;  %v1568_v35 = vpop.f32.mrb[31].mxu1 }
 0x382   : > { %1608 = vst [vmem:[%s3103_s23 + $0xe0] sm:$0xff] %v1566_v30  ;;  %v1569_v57 = vadd.f32 %v3099_v20, %v1568_v35 }
 0x383   : > { %1611 = vst [vmem:[%s3103_s23 + $0xf8] sm:$0xff] %v1577_v29 }
 0x384   : > { %1609 = vst [vmem:[%s3103_s23 + $0xe8] sm:$0xff] %v1569_v57 }
 0x385   : > { %2221 = shalt.err (!%p2218_p4)
}
 0x386   : > { %s2222_s6 = scalar_lea.hbm %s3168_s24, 4096  ;;  %s2226_s11 = scalar_lea.hbm %s3222_s4, 8192 }
 0x387   : > { %p2223_p9 = scmp.ne.s32.totalorder %s3168_s24, %s2222_s6  ;;  %p2227_p8 = scmp.lt.u32.totalorder %s3168_s24, %s3222_s4 }
 0x388   : > { %p2228_p13 = scmp.lt.u32.totalorder %s2226_s11, %s2222_s6  ;;  %p2230_p10 = scmp.lt.u32.totalorder %s2222_s6, %s3168_s24 }
 0x389   : > { %p2224_p0 = pnand %p2223_p9, %p2465_p5 }
 0x38a   : > { %p2229_p6 = por %p2228_p13, %p2227_p8 }
 0x38b   : > { %p2225_p11 = pneg %p2224_p0 }
 0x38c   : > { %p2231_p3 = por %p2230_p10, %p2229_p6 }
 0x38e   : > { %p2232_p7 = pnand %p2231_p3, %p2225_p11 }
 0x390   : > { %2235 = shalt.err (!%p2232_p7)
}
 0x391   : > { %s2293_s23 = smov 128   ;;  %s2294_s5 = smov 8  }
 0x392   : > { %1935 = dma.vmem_to_hbm [thread:$0]  (%p2465_p5), %s3170_s7, 4096, %s3168_s24, %s1613_s19, %s2293_s23, %s2293_s23, %s2294_s5  }
 0x393 PF: > { %s1641_s8 = sand.u32 1, %s2270_s15   ;;  %p3243_p12 = scmp.ne.s32.totalorder %s3227_s22, 0 }
 0x394   : > { %p3244_p2 = scmp.ge.s32.totalorder %s2282_s18, 2  ;;  %s1642_s9 = scalar_lea.sflag [#allocation4], %s1641_s8 }
 0x396   : > { %p1952_p1 = pnand %p3244_p2, %p3243_p12 }
 0x398   : > { %2265 = dma.done.wait (!%p1952_p1), %s1642_s9, 4096  }
 0x399   : > { %2267 = vsyncadd (!%p1952_p1), %s1642_s9, 4294963200  ;;  %p19_p4 = scmp.ge.s32.totalorder %s2451_s10, 4   ;;  %s3245_s15 = smov %s2274_s16 }
 0x39a   : > { %s3246_s16 = smov %s2278_s17  ;;  %s3247_s17 = smov %s2461_s25 }
 0x39b   : > { %s3248_s18 = smov %s2451_s10  ;;  %21 = sbr.rel (!%p19_p4) target bundleno = 7 (0x7), region = 93 }
 0x3a2   :  { %1647 = vsyncpa [#allocation3], 1 }
 0x3a3   :  { %1649 = vsyncpa [#allocation3 + $0x1], 1 }
 0x3a4   :  { %1650 = vsyncpa [#allocation6], 1 }
 0x3a5   :  { %1651 = vsyncpa [#allocation9], 1 }
 0x3a6   :  { %1652 = vsyncpa [#allocation4], 1 }
 0x3a7   :  { %1654 = vsyncpa [#allocation4 + $0x1], 1 }

</bundles_post_ra>
